<compile_context>
chip_gen: v7x
topology: tpu7x:2x2x1
jax: 0.10.0
libtpu: 0.0.40
codegen_flags: <defaults>
</compile_context>

<pallas_src>
import jax
import jax.numpy as jnp
from jax import lax
from jax.experimental import pallas as pl
from jax.experimental.pallas import tpu as pltpu

# ----------------------- small config (consistent with the module) -----------
IN_LEN = 8                     # args['in_length']
OUT_LEN = 8                    # args['out_length']
BATCH = 2
N_NBRS = 6                     # total neighbours across the batch
ENC = 32                       # encoder_size == soc_conv_depth
EMB = 16                       # input_embedding_size
DYN = 16                       # dyn_embedding_size
DEC = 32                       # decoder_size
GRID = (13, 3)                 # grid_size
C31 = 8                        # conv_3x1_depth
SOC_EMB = ((GRID[0] - 4 + 1) // 2) * C31      # 5 * 8 = 40
ENC_DIM = SOC_EMB + DYN                        # decoder input (use_maneuvers=False)
NB = BATCH + N_NBRS                            # fused encoder batch = 8

_VMEM = pl.BlockSpec(memory_space=pltpu.MemorySpace.VMEM)


# ----------------------------- fused Pallas kernel ----------------------------
def _slstm_fused_kernel(x_ref, wip_ref, bip_ref, ewih_ref, ewhh_ref, eb_ref,
                        wdyn_ref, bdyn_ref, gsoc_ref, bsoc_ref,
                        dwih_soc_ref, dwih_dyn_ref, db_ref, dwhh_ref,
                        wop_ref, bop_ref, out_ref, soc_scr, hdec_scr):
    f32 = jnp.float32
    H = ENC
    HD = DEC

    def lrelu(v):
        return jnp.where(v >= 0, v, 0.1 * v)

    # ---------------- encoder: hoisted non-recurrent work (all T at once) -----
    e_all = lrelu(jnp.dot(x_ref[...], wip_ref[...], preferred_element_type=f32)
                  + bip_ref[...])                                   # [T*NB, EMB]
    xg_all = (jnp.dot(e_all, ewih_ref[...], preferred_element_type=f32)
              + eb_ref[...])                                        # [T*NB, 4H]

    h = jnp.zeros((NB, H), f32)
    c = jnp.zeros((NB, H), f32)
    for t in range(IN_LEN):                       # fully unrolled recurrence
        gates = (xg_all[t * NB:(t + 1) * NB, :]
                 + jnp.dot(h, ewhh_ref[...], preferred_element_type=f32))   # [8, 4H]
        sg = jax.nn.sigmoid(gates)                # one full-vreg EUP pass
        th = jnp.tanh(gates)                      # one full-vreg EUP pass
        gi = sg[:, 0 * H:1 * H]
        gf = sg[:, 1 * H:2 * H]
        gg = th[:, 2 * H:3 * H]
        go = sg[:, 3 * H:4 * H]
        c = gf * c + gi * gg
        h = go * jnp.tanh(c)

    hist_h = h[0:BATCH, :]                                          # [B, ENC]
    hist_enc = lrelu(jnp.dot(hist_h, wdyn_ref[...], preferred_element_type=f32)
                     + bdyn_ref[...])                               # [B, DYN]

    # ---------------- social pooling (scatter+permute+soc_fc folded in gsoc) --
    for b in range(BATCH):
        acc = bsoc_ref[...]                                         # [1, SOC_EMB]
        for n in range(N_NBRS):
            acc = acc + jnp.dot(h[BATCH + n:BATCH + n + 1, :],
                                gsoc_ref[b * N_NBRS + n],
                                preferred_element_type=f32)         # [1, SOC_EMB]
        soc_scr[b:b + 1, :] = acc
    soc_enc = lrelu(soc_scr[...])                                   # [B, SOC_EMB]

    # ---------------- decoder: constant input -> gate pre-activation once -----
    xg_dec = (jnp.dot(soc_enc, dwih_soc_ref[...], preferred_element_type=f32)
              + jnp.dot(hist_enc, dwih_dyn_ref[...], preferred_element_type=f32)
              + db_ref[...])                                        # [B, 4*DEC]
    hd = jnp.zeros((BATCH, HD), f32)
    cd = jnp.zeros((BATCH, HD), f32)
    for t in range(OUT_LEN):                      # fully unrolled recurrence
        gates = xg_dec + jnp.dot(hd, dwhh_ref[...], preferred_element_type=f32)
        sg = jax.nn.sigmoid(gates)
        th = jnp.tanh(gates)
        gi = sg[:, 0 * HD:1 * HD]
        gf = sg[:, 1 * HD:2 * HD]
        gg = th[:, 2 * HD:3 * HD]
        go = sg[:, 3 * HD:4 * HD]
        cd = gf * cd + gi * gg
        hd = go * jnp.tanh(cd)
        hdec_scr[t * BATCH:(t + 1) * BATCH, :] = hd                 # collect h

    # ---------------- deferred op head + outputActivation (one batched pass) --
    y = (jnp.dot(hdec_scr[...], wop_ref[...], preferred_element_type=f32)
         + bop_ref[...])                                            # [OUT_LEN*B, 5]
    col = lax.broadcasted_iota(jnp.int32, y.shape, 1)
    y = jnp.where(col < 2, y, jnp.where(col < 4, jnp.exp(y), jnp.tanh(y)))
    out_ref[...] = y


# ----------------------------- plain-JAX glue ---------------------------------
# TODO(synk): masked_scatter_ is a data-dependent scatter; it is folded (outside
# the kernel) into a per-(batch, neighbour) selection of soc_fc weight slabs
# rather than performed as an in-kernel gather.
def masked_scatter_cells(nbr_idx, nbrs_enc):
    """Reproduces torch.Tensor.masked_scatter_ for cell-uniform boolean masks
    (used only by the pure-JAX reference)."""
    B, W, G0, E = nbr_idx.shape
    cell_mask = nbr_idx[..., 0].reshape(-1)                      # [B*W*G0]
    order = jnp.cumsum(cell_mask.astype(jnp.int32)) - 1
    gathered = nbrs_enc[jnp.clip(order, 0, nbrs_enc.shape[0] - 1)]
    soc = jnp.where(cell_mask[:, None], gathered, 0.0).reshape(B, W, G0, E)
    return soc


def build_soc_fold(nbr_idx, w_soc_t):
    """Fold masked_scatter + permute(0,3,2,1) + flatten + soc_fc weight into
    G[b*N + n] in [ENC, SOC_EMB]:  soc_pre[b] = b_soc + sum_n nbrs_enc[n] @ G[b*N+n]."""
    B = nbr_idx.shape[0]
    cell_mask = nbr_idx[..., 0]                                  # [B, 3, 13] bool
    flat = cell_mask.reshape(-1)
    order = jnp.clip(jnp.cumsum(flat.astype(jnp.int32)) - 1, 0, N_NBRS - 1)
    sel = jax.nn.one_hot(order, N_NBRS, dtype=jnp.float32) * flat[:, None].astype(jnp.float32)
    sel = sel.reshape(B, GRID[1], GRID[0], N_NBRS)               # S[b, w, g, n]
    w_r = w_soc_t.reshape(ENC, GRID[0], GRID[1], SOC_EMB)        # W[e, g, w, s]
    g_fold = jnp.einsum('bwgn,egws->bnes', sel, w_r,
                        precision=lax.Precision.HIGHEST)         # [B, N, ENC, SOC_EMB]
    return g_fold.reshape(B * N_NBRS, ENC, SOC_EMB)


def slstm_forward(params, egoHist, nbrHist, nbrIdx):
    # batched encoder input: ego (rows 0..B-1) + neighbours (rows B..B+N-1)
    x_all = jnp.concatenate([egoHist, nbrHist], axis=1)          # [T, B+N, 2]
    x_all = x_all.reshape(IN_LEN * NB, 2)
    g_soc = build_soc_fold(nbrIdx, params['w_soc_t'])            # [B*N, ENC, SOC_EMB]
    dwih_soc = params['dec_wih_t'][:SOC_EMB, :]
    dwih_dyn = params['dec_wih_t'][SOC_EMB:, :]

    out = pl.pallas_call(
        _slstm_fused_kernel,
        out_shape=jax.ShapeDtypeStruct((OUT_LEN * BATCH, 5), jnp.float32),
        in_specs=[_VMEM] * 16,
        out_specs=_VMEM,
        scratch_shapes=[pltpu.VMEM((BATCH, SOC_EMB), jnp.float32),
                        pltpu.VMEM((OUT_LEN * BATCH, DEC), jnp.float32)],
    )(x_all, params['w_ip_t'], params['b_ip'],
      params['enc_wih_t'], params['enc_whh_t'], params['enc_b'],
      params['w_dyn_t'], params['b_dyn'],
      g_soc, params['b_soc'],
      dwih_soc, dwih_dyn, params['dec_b'], params['dec_whh_t'],
      params['w_op_t'], params['b_op'])
    return out.reshape(OUT_LEN, BATCH, 5)


# ----------------------------- parameters -------------------------------------
def init_params(key):
    ks = jax.random.split(key, 14)
    s = 0.1

    def W(k, shape):
        return jax.random.normal(k, shape, jnp.float32) * s

    return dict(
        w_ip_t=W(ks[0], (2, EMB)),              b_ip=W(ks[1], (1, EMB)),
        enc_wih_t=W(ks[2], (EMB, 4 * ENC)),     enc_whh_t=W(ks[3], (ENC, 4 * ENC)),
        enc_b=W(ks[4], (1, 4 * ENC)),           # b_ih + b_hh combined
        w_dyn_t=W(ks[5], (ENC, DYN)),           b_dyn=W(ks[6], (1, DYN)),
        w_soc_t=W(ks[7], (ENC * GRID[0] * GRID[1], SOC_EMB)),
        b_soc=W(ks[8], (1, SOC_EMB)),
        dec_wih_t=W(ks[9], (ENC_DIM, 4 * DEC)), dec_whh_t=W(ks[10], (DEC, 4 * DEC)),
        dec_b=W(ks[11], (1, 4 * DEC)),
        w_op_t=W(ks[12], (DEC, 5)),             b_op=W(ks[13], (1, 5)),
    )


# ----------------------------- pure-JAX reference -----------------------------
def ref_forward(params, egoHist, nbrHist, nbrIdx):
    def lrelu(x):
        return jnp.where(x >= 0, x, 0.1 * x)

    def lstm_enc(x):
        e = lrelu(x @ params['w_ip_t'] + params['b_ip'])
        B = x.shape[1]
        H = ENC

        def step(carry, e_t):
            h, c = carry
            gates = e_t @ params['enc_wih_t'] + h @ params['enc_whh_t'] + params['enc_b']
            i = jax.nn.sigmoid(gates[:, :H]); f = jax.nn.sigmoid(gates[:, H:2 * H])
            g = jnp.tanh(gates[:, 2 * H:3 * H]); o = jax.nn.sigmoid(gates[:, 3 * H:])
            c = f * c + i * g
            h = o * jnp.tanh(c)
            return (h, c), None

        (h, _), _ = lax.scan(step, (jnp.zeros((B, H)), jnp.zeros((B, H))), e)
        return h

    hist_enc = lrelu(lstm_enc(egoHist) @ params['w_dyn_t'] + params['b_dyn'])
    nbrs_enc = lstm_enc(nbrHist)
    soc = masked_scatter_cells(nbrIdx, nbrs_enc)
    soc = jnp.transpose(soc, (0, 3, 2, 1)).reshape(BATCH, ENC * GRID[0] * GRID[1])
    soc_enc = lrelu(soc @ params['w_soc_t'] + params['b_soc'])
    enc = jnp.concatenate([soc_enc, hist_enc], axis=1)
    H = DEC

    def dec_step(carry, _):
        h, c = carry
        gates = enc @ params['dec_wih_t'] + h @ params['dec_whh_t'] + params['dec_b']
        i = jax.nn.sigmoid(gates[:, :H]); f = jax.nn.sigmoid(gates[:, H:2 * H])
        g = jnp.tanh(gates[:, 2 * H:3 * H]); o = jax.nn.sigmoid(gates[:, 3 * H:])
        c = f * c + i * g
        h = o * jnp.tanh(c)
        y = h @ params['w_op_t'] + params['b_op']
        out = jnp.concatenate([y[:, 0:2], jnp.exp(y[:, 2:4]), jnp.tanh(y[:, 4:5])], axis=1)
        return (h, c), out

    _, outs = lax.scan(dec_step, (jnp.zeros((BATCH, H)), jnp.zeros((BATCH, H))),
                       None, length=OUT_LEN)
    return outs                                                   # [OUT_LEN, B, 5]


# ----------------------------- main --------------------------------------------
if __name__ == "__main__":
    key = jax.random.PRNGKey(0)
    kp, k1, k2 = jax.random.split(key, 3)
    params = init_params(kp)

    egoHist = jax.random.normal(k1, (IN_LEN, BATCH, 2), jnp.float32)
    nbrHist = jax.random.normal(k2, (IN_LEN, N_NBRS, 2), jnp.float32)

    # boolean occupancy mask [B, grid_w=3, grid_h=13, ENC]; occupied cells are
    # entirely True (standard construction for nbrIdx / masked_scatter_).
    mask = jnp.zeros((BATCH, GRID[1], GRID[0], ENC), dtype=bool)
    cells = [(0, 0, 2), (0, 1, 5), (0, 2, 10), (1, 0, 0), (1, 1, 7), (1, 2, 12)]
    for (b, w, g) in cells:
        mask = mask.at[b, w, g, :].set(True)

    fwd = jax.jit(slstm_forward)
    fut_pred = fwd(params, egoHist, nbrHist, mask)
    fut_pred = jax.block_until_ready(fut_pred)

    ref = ref_forward(params, egoHist, nbrHist, mask)
    assert fut_pred.shape == (OUT_LEN, BATCH, 5), fut_pred.shape
    assert jnp.allclose(fut_pred, ref, rtol=2e-2, atol=2e-2), "mismatch vs JAX reference"

    # TODO(synk): use_maneuvers=True branch (op_lat/op_lon softmax heads) not implemented.
    print("KERNEL_OK")
</pallas_src>

<mosaic_0001>
module attributes {stable_mosaic.version = 11 : i64} {
  func.func @_slstm_fused_kernel(%arg0: memref<64x2xf32, #tpu.memory_space<vmem>>, %arg1: memref<2x16xf32, #tpu.memory_space<vmem>>, %arg2: memref<1x16xf32, #tpu.memory_space<vmem>>, %arg3: memref<16x128xf32, #tpu.memory_space<vmem>>, %arg4: memref<32x128xf32, #tpu.memory_space<vmem>>, %arg5: memref<1x128xf32, #tpu.memory_space<vmem>>, %arg6: memref<32x16xf32, #tpu.memory_space<vmem>>, %arg7: memref<1x16xf32, #tpu.memory_space<vmem>>, %arg8: memref<12x32x40xf32, #tpu.memory_space<vmem>>, %arg9: memref<1x40xf32, #tpu.memory_space<vmem>>, %arg10: memref<40x128xf32, #tpu.memory_space<vmem>>, %arg11: memref<16x128xf32, #tpu.memory_space<vmem>>, %arg12: memref<1x128xf32, #tpu.memory_space<vmem>>, %arg13: memref<32x128xf32, #tpu.memory_space<vmem>>, %arg14: memref<32x5xf32, #tpu.memory_space<vmem>>, %arg15: memref<1x5xf32, #tpu.memory_space<vmem>>, %arg16: memref<16x5xf32, #tpu.memory_space<vmem>>, %arg17: memref<2x40xf32, #tpu.memory_space<vmem>>, %arg18: memref<16x32xf32, #tpu.memory_space<vmem>>) attributes {dimension_semantics = [], scalar_prefetch = 0 : i64, scratch_operands = 2 : i64, tpu.core_type = #tpu.core_type<tc>} {
    %c0 = arith.constant 0 : index
    %c0_0 = arith.constant 0 : index
    %0 = vector.load %arg0[%c0, %c0_0] : memref<64x2xf32, #tpu.memory_space<vmem>>, vector<64x2xf32>
    %c0_1 = arith.constant 0 : index
    %c0_2 = arith.constant 0 : index
    %1 = vector.load %arg1[%c0_1, %c0_2] : memref<2x16xf32, #tpu.memory_space<vmem>>, vector<2x16xf32>
    %cst = arith.constant dense<0.000000e+00> : vector<64x16xf32>
    %2 = tpu.matmul %0, %1, %cst {dimension_numbers = #tpu.dot_dimension_numbers<[1], [0], [0], [1], [0, 0, 1, 1], [], []>} : vector<64x2xf32>, vector<2x16xf32>, vector<64x16xf32> -> vector<64x16xf32>
    %c0_3 = arith.constant 0 : index
    %c0_4 = arith.constant 0 : index
    %3 = vector.load %arg2[%c0_3, %c0_4] : memref<1x16xf32, #tpu.memory_space<vmem>>, vector<1x16xf32>
    %4 = vector.broadcast %3 : vector<1x16xf32> to vector<64x16xf32>
    %5 = arith.addf %2, %4 : vector<64x16xf32>
    %cst_5 = arith.constant 0.000000e+00 : f32
    %6 = vector.broadcast %cst_5 : f32 to vector<64x16xf32>
    %7 = arith.cmpf oge, %5, %6 : vector<64x16xf32>
    %cst_6 = arith.constant 1.000000e-01 : f32
    %8 = vector.broadcast %cst_6 : f32 to vector<64x16xf32>
    %9 = arith.mulf %8, %5 : vector<64x16xf32>
    %10 = arith.select %7, %5, %9 : vector<64x16xi1>, vector<64x16xf32>
    %c0_7 = arith.constant 0 : index
    %c0_8 = arith.constant 0 : index
    %11 = vector.load %arg3[%c0_7, %c0_8] : memref<16x128xf32, #tpu.memory_space<vmem>>, vector<16x128xf32>
    %cst_9 = arith.constant dense<0.000000e+00> : vector<64x128xf32>
    %12 = tpu.matmul %10, %11, %cst_9 {dimension_numbers = #tpu.dot_dimension_numbers<[1], [0], [0], [1], [0, 0, 1, 1], [], []>} : vector<64x16xf32>, vector<16x128xf32>, vector<64x128xf32> -> vector<64x128xf32>
    %c0_10 = arith.constant 0 : index
    %c0_11 = arith.constant 0 : index
    %13 = vector.load %arg5[%c0_10, %c0_11] : memref<1x128xf32, #tpu.memory_space<vmem>>, vector<1x128xf32>
    %14 = vector.broadcast %13 : vector<1x128xf32> to vector<64x128xf32>
    %15 = arith.addf %12, %14 : vector<64x128xf32>
    %cst_12 = arith.constant 0.000000e+00 : f32
    %16 = vector.broadcast %cst_12 : f32 to vector<8x32xf32>
    %cst_13 = arith.constant 0.000000e+00 : f32
    %17 = vector.broadcast %cst_13 : f32 to vector<8x32xf32>
    %18 = vector.extract_strided_slice %15 {offsets = [0, 0], sizes = [8, 128], strides = [1, 1]} : vector<64x128xf32> to vector<8x128xf32>
    %c0_14 = arith.constant 0 : index
    %c0_15 = arith.constant 0 : index
    %19 = vector.load %arg4[%c0_14, %c0_15] : memref<32x128xf32, #tpu.memory_space<vmem>>, vector<32x128xf32>
    %cst_16 = arith.constant dense<0.000000e+00> : vector<8x128xf32>
    %20 = tpu.matmul %16, %19, %cst_16 {dimension_numbers = #tpu.dot_dimension_numbers<[1], [0], [0], [1], [0, 0, 1, 1], [], []>} : vector<8x32xf32>, vector<32x128xf32>, vector<8x128xf32> -> vector<8x128xf32>
    %21 = arith.addf %18, %20 : vector<8x128xf32>
    %22 = arith.negf %21 : vector<8x128xf32>
    %23 = math.exp %22 : vector<8x128xf32>
    %cst_17 = arith.constant 1.000000e+00 : f32
    %24 = vector.broadcast %cst_17 : f32 to vector<8x128xf32>
    %25 = arith.addf %24, %23 : vector<8x128xf32>
    %26 = arith.divf %24, %25 : vector<8x128xf32>
    %27 = math.tanh %21 : vector<8x128xf32>
    %28 = vector.extract_strided_slice %26 {offsets = [0, 0], sizes = [8, 32], strides = [1, 1]} : vector<8x128xf32> to vector<8x32xf32>
    %29 = vector.extract_strided_slice %26 {offsets = [0, 32], sizes = [8, 32], strides = [1, 1]} : vector<8x128xf32> to vector<8x32xf32>
    %30 = vector.extract_strided_slice %27 {offsets = [0, 64], sizes = [8, 32], strides = [1, 1]} : vector<8x128xf32> to vector<8x32xf32>
    %31 = vector.extract_strided_slice %26 {offsets = [0, 96], sizes = [8, 32], strides = [1, 1]} : vector<8x128xf32> to vector<8x32xf32>
    %32 = arith.mulf %29, %17 : vector<8x32xf32>
    %33 = arith.mulf %28, %30 : vector<8x32xf32>
    %34 = arith.addf %32, %33 : vector<8x32xf32>
    %35 = math.tanh %34 : vector<8x32xf32>
    %36 = arith.mulf %31, %35 : vector<8x32xf32>
    %37 = vector.extract_strided_slice %15 {offsets = [8, 0], sizes = [8, 128], strides = [1, 1]} : vector<64x128xf32> to vector<8x128xf32>
    %c0_18 = arith.constant 0 : index
    %c0_19 = arith.constant 0 : index
    %38 = vector.load %arg4[%c0_18, %c0_19] : memref<32x128xf32, #tpu.memory_space<vmem>>, vector<32x128xf32>
    %cst_20 = arith.constant dense<0.000000e+00> : vector<8x128xf32>
    %39 = tpu.matmul %36, %38, %cst_20 {dimension_numbers = #tpu.dot_dimension_numbers<[1], [0], [0], [1], [0, 0, 1, 1], [], []>} : vector<8x32xf32>, vector<32x128xf32>, vector<8x128xf32> -> vector<8x128xf32>
    %40 = arith.addf %37, %39 : vector<8x128xf32>
    %41 = arith.negf %40 : vector<8x128xf32>
    %42 = math.exp %41 : vector<8x128xf32>
    %cst_21 = arith.constant 1.000000e+00 : f32
    %43 = vector.broadcast %cst_21 : f32 to vector<8x128xf32>
    %44 = arith.addf %43, %42 : vector<8x128xf32>
    %45 = arith.divf %43, %44 : vector<8x128xf32>
    %46 = math.tanh %40 : vector<8x128xf32>
    %47 = vector.extract_strided_slice %45 {offsets = [0, 0], sizes = [8, 32], strides = [1, 1]} : vector<8x128xf32> to vector<8x32xf32>
    %48 = vector.extract_strided_slice %45 {offsets = [0, 32], sizes = [8, 32], strides = [1, 1]} : vector<8x128xf32> to vector<8x32xf32>
    %49 = vector.extract_strided_slice %46 {offsets = [0, 64], sizes = [8, 32], strides = [1, 1]} : vector<8x128xf32> to vector<8x32xf32>
    %50 = vector.extract_strided_slice %45 {offsets = [0, 96], sizes = [8, 32], strides = [1, 1]} : vector<8x128xf32> to vector<8x32xf32>
    %51 = arith.mulf %48, %34 : vector<8x32xf32>
    %52 = arith.mulf %47, %49 : vector<8x32xf32>
    %53 = arith.addf %51, %52 : vector<8x32xf32>
    %54 = math.tanh %53 : vector<8x32xf32>
    %55 = arith.mulf %50, %54 : vector<8x32xf32>
    %56 = vector.extract_strided_slice %15 {offsets = [16, 0], sizes = [8, 128], strides = [1, 1]} : vector<64x128xf32> to vector<8x128xf32>
    %c0_22 = arith.constant 0 : index
    %c0_23 = arith.constant 0 : index
    %57 = vector.load %arg4[%c0_22, %c0_23] : memref<32x128xf32, #tpu.memory_space<vmem>>, vector<32x128xf32>
    %cst_24 = arith.constant dense<0.000000e+00> : vector<8x128xf32>
    %58 = tpu.matmul %55, %57, %cst_24 {dimension_numbers = #tpu.dot_dimension_numbers<[1], [0], [0], [1], [0, 0, 1, 1], [], []>} : vector<8x32xf32>, vector<32x128xf32>, vector<8x128xf32> -> vector<8x128xf32>
    %59 = arith.addf %56, %58 : vector<8x128xf32>
    %60 = arith.negf %59 : vector<8x128xf32>
    %61 = math.exp %60 : vector<8x128xf32>
    %cst_25 = arith.constant 1.000000e+00 : f32
    %62 = vector.broadcast %cst_25 : f32 to vector<8x128xf32>
    %63 = arith.addf %62, %61 : vector<8x128xf32>
    %64 = arith.divf %62, %63 : vector<8x128xf32>
    %65 = math.tanh %59 : vector<8x128xf32>
    %66 = vector.extract_strided_slice %64 {offsets = [0, 0], sizes = [8, 32], strides = [1, 1]} : vector<8x128xf32> to vector<8x32xf32>
    %67 = vector.extract_strided_slice %64 {offsets = [0, 32], sizes = [8, 32], strides = [1, 1]} : vector<8x128xf32> to vector<8x32xf32>
    %68 = vector.extract_strided_slice %65 {offsets = [0, 64], sizes = [8, 32], strides = [1, 1]} : vector<8x128xf32> to vector<8x32xf32>
    %69 = vector.extract_strided_slice %64 {offsets = [0, 96], sizes = [8, 32], strides = [1, 1]} : vector<8x128xf32> to vector<8x32xf32>
    %70 = arith.mulf %67, %53 : vector<8x32xf32>
    %71 = arith.mulf %66, %68 : vector<8x32xf32>
    %72 = arith.addf %70, %71 : vector<8x32xf32>
    %73 = math.tanh %72 : vector<8x32xf32>
    %74 = arith.mulf %69, %73 : vector<8x32xf32>
    %75 = vector.extract_strided_slice %15 {offsets = [24, 0], sizes = [8, 128], strides = [1, 1]} : vector<64x128xf32> to vector<8x128xf32>
    %c0_26 = arith.constant 0 : index
    %c0_27 = arith.constant 0 : index
    %76 = vector.load %arg4[%c0_26, %c0_27] : memref<32x128xf32, #tpu.memory_space<vmem>>, vector<32x128xf32>
    %cst_28 = arith.constant dense<0.000000e+00> : vector<8x128xf32>
    %77 = tpu.matmul %74, %76, %cst_28 {dimension_numbers = #tpu.dot_dimension_numbers<[1], [0], [0], [1], [0, 0, 1, 1], [], []>} : vector<8x32xf32>, vector<32x128xf32>, vector<8x128xf32> -> vector<8x128xf32>
    %78 = arith.addf %75, %77 : vector<8x128xf32>
    %79 = arith.negf %78 : vector<8x128xf32>
    %80 = math.exp %79 : vector<8x128xf32>
    %cst_29 = arith.constant 1.000000e+00 : f32
    %81 = vector.broadcast %cst_29 : f32 to vector<8x128xf32>
    %82 = arith.addf %81, %80 : vector<8x128xf32>
    %83 = arith.divf %81, %82 : vector<8x128xf32>
    %84 = math.tanh %78 : vector<8x128xf32>
    %85 = vector.extract_strided_slice %83 {offsets = [0, 0], sizes = [8, 32], strides = [1, 1]} : vector<8x128xf32> to vector<8x32xf32>
    %86 = vector.extract_strided_slice %83 {offsets = [0, 32], sizes = [8, 32], strides = [1, 1]} : vector<8x128xf32> to vector<8x32xf32>
    %87 = vector.extract_strided_slice %84 {offsets = [0, 64], sizes = [8, 32], strides = [1, 1]} : vector<8x128xf32> to vector<8x32xf32>
    %88 = vector.extract_strided_slice %83 {offsets = [0, 96], sizes = [8, 32], strides = [1, 1]} : vector<8x128xf32> to vector<8x32xf32>
    %89 = arith.mulf %86, %72 : vector<8x32xf32>
    %90 = arith.mulf %85, %87 : vector<8x32xf32>
    %91 = arith.addf %89, %90 : vector<8x32xf32>
    %92 = math.tanh %91 : vector<8x32xf32>
    %93 = arith.mulf %88, %92 : vector<8x32xf32>
    %94 = vector.extract_strided_slice %15 {offsets = [32, 0], sizes = [8, 128], strides = [1, 1]} : vector<64x128xf32> to vector<8x128xf32>
    %c0_30 = arith.constant 0 : index
    %c0_31 = arith.constant 0 : index
    %95 = vector.load %arg4[%c0_30, %c0_31] : memref<32x128xf32, #tpu.memory_space<vmem>>, vector<32x128xf32>
    %cst_32 = arith.constant dense<0.000000e+00> : vector<8x128xf32>
    %96 = tpu.matmul %93, %95, %cst_32 {dimension_numbers = #tpu.dot_dimension_numbers<[1], [0], [0], [1], [0, 0, 1, 1], [], []>} : vector<8x32xf32>, vector<32x128xf32>, vector<8x128xf32> -> vector<8x128xf32>
    %97 = arith.addf %94, %96 : vector<8x128xf32>
    %98 = arith.negf %97 : vector<8x128xf32>
    %99 = math.exp %98 : vector<8x128xf32>
    %cst_33 = arith.constant 1.000000e+00 : f32
    %100 = vector.broadcast %cst_33 : f32 to vector<8x128xf32>
    %101 = arith.addf %100, %99 : vector<8x128xf32>
    %102 = arith.divf %100, %101 : vector<8x128xf32>
    %103 = math.tanh %97 : vector<8x128xf32>
    %104 = vector.extract_strided_slice %102 {offsets = [0, 0], sizes = [8, 32], strides = [1, 1]} : vector<8x128xf32> to vector<8x32xf32>
    %105 = vector.extract_strided_slice %102 {offsets = [0, 32], sizes = [8, 32], strides = [1, 1]} : vector<8x128xf32> to vector<8x32xf32>
    %106 = vector.extract_strided_slice %103 {offsets = [0, 64], sizes = [8, 32], strides = [1, 1]} : vector<8x128xf32> to vector<8x32xf32>
    %107 = vector.extract_strided_slice %102 {offsets = [0, 96], sizes = [8, 32], strides = [1, 1]} : vector<8x128xf32> to vector<8x32xf32>
    %108 = arith.mulf %105, %91 : vector<8x32xf32>
    %109 = arith.mulf %104, %106 : vector<8x32xf32>
    %110 = arith.addf %108, %109 : vector<8x32xf32>
    %111 = math.tanh %110 : vector<8x32xf32>
    %112 = arith.mulf %107, %111 : vector<8x32xf32>
    %113 = vector.extract_strided_slice %15 {offsets = [40, 0], sizes = [8, 128], strides = [1, 1]} : vector<64x128xf32> to vector<8x128xf32>
    %c0_34 = arith.constant 0 : index
    %c0_35 = arith.constant 0 : index
    %114 = vector.load %arg4[%c0_34, %c0_35] : memref<32x128xf32, #tpu.memory_space<vmem>>, vector<32x128xf32>
    %cst_36 = arith.constant dense<0.000000e+00> : vector<8x128xf32>
    %115 = tpu.matmul %112, %114, %cst_36 {dimension_numbers = #tpu.dot_dimension_numbers<[1], [0], [0], [1], [0, 0, 1, 1], [], []>} : vector<8x32xf32>, vector<32x128xf32>, vector<8x128xf32> -> vector<8x128xf32>
    %116 = arith.addf %113, %115 : vector<8x128xf32>
    %117 = arith.negf %116 : vector<8x128xf32>
    %118 = math.exp %117 : vector<8x128xf32>
    %cst_37 = arith.constant 1.000000e+00 : f32
    %119 = vector.broadcast %cst_37 : f32 to vector<8x128xf32>
    %120 = arith.addf %119, %118 : vector<8x128xf32>
    %121 = arith.divf %119, %120 : vector<8x128xf32>
    %122 = math.tanh %116 : vector<8x128xf32>
    %123 = vector.extract_strided_slice %121 {offsets = [0, 0], sizes = [8, 32], strides = [1, 1]} : vector<8x128xf32> to vector<8x32xf32>
    %124 = vector.extract_strided_slice %121 {offsets = [0, 32], sizes = [8, 32], strides = [1, 1]} : vector<8x128xf32> to vector<8x32xf32>
    %125 = vector.extract_strided_slice %122 {offsets = [0, 64], sizes = [8, 32], strides = [1, 1]} : vector<8x128xf32> to vector<8x32xf32>
    %126 = vector.extract_strided_slice %121 {offsets = [0, 96], sizes = [8, 32], strides = [1, 1]} : vector<8x128xf32> to vector<8x32xf32>
    %127 = arith.mulf %124, %110 : vector<8x32xf32>
    %128 = arith.mulf %123, %125 : vector<8x32xf32>
    %129 = arith.addf %127, %128 : vector<8x32xf32>
    %130 = math.tanh %129 : vector<8x32xf32>
    %131 = arith.mulf %126, %130 : vector<8x32xf32>
    %132 = vector.extract_strided_slice %15 {offsets = [48, 0], sizes = [8, 128], strides = [1, 1]} : vector<64x128xf32> to vector<8x128xf32>
    %c0_38 = arith.constant 0 : index
    %c0_39 = arith.constant 0 : index
    %133 = vector.load %arg4[%c0_38, %c0_39] : memref<32x128xf32, #tpu.memory_space<vmem>>, vector<32x128xf32>
    %cst_40 = arith.constant dense<0.000000e+00> : vector<8x128xf32>
    %134 = tpu.matmul %131, %133, %cst_40 {dimension_numbers = #tpu.dot_dimension_numbers<[1], [0], [0], [1], [0, 0, 1, 1], [], []>} : vector<8x32xf32>, vector<32x128xf32>, vector<8x128xf32> -> vector<8x128xf32>
    %135 = arith.addf %132, %134 : vector<8x128xf32>
    %136 = arith.negf %135 : vector<8x128xf32>
    %137 = math.exp %136 : vector<8x128xf32>
    %cst_41 = arith.constant 1.000000e+00 : f32
    %138 = vector.broadcast %cst_41 : f32 to vector<8x128xf32>
    %139 = arith.addf %138, %137 : vector<8x128xf32>
    %140 = arith.divf %138, %139 : vector<8x128xf32>
    %141 = math.tanh %135 : vector<8x128xf32>
    %142 = vector.extract_strided_slice %140 {offsets = [0, 0], sizes = [8, 32], strides = [1, 1]} : vector<8x128xf32> to vector<8x32xf32>
    %143 = vector.extract_strided_slice %140 {offsets = [0, 32], sizes = [8, 32], strides = [1, 1]} : vector<8x128xf32> to vector<8x32xf32>
    %144 = vector.extract_strided_slice %141 {offsets = [0, 64], sizes = [8, 32], strides = [1, 1]} : vector<8x128xf32> to vector<8x32xf32>
    %145 = vector.extract_strided_slice %140 {offsets = [0, 96], sizes = [8, 32], strides = [1, 1]} : vector<8x128xf32> to vector<8x32xf32>
    %146 = arith.mulf %143, %129 : vector<8x32xf32>
    %147 = arith.mulf %142, %144 : vector<8x32xf32>
    %148 = arith.addf %146, %147 : vector<8x32xf32>
    %149 = math.tanh %148 : vector<8x32xf32>
    %150 = arith.mulf %145, %149 : vector<8x32xf32>
    %151 = vector.extract_strided_slice %15 {offsets = [56, 0], sizes = [8, 128], strides = [1, 1]} : vector<64x128xf32> to vector<8x128xf32>
    %c0_42 = arith.constant 0 : index
    %c0_43 = arith.constant 0 : index
    %152 = vector.load %arg4[%c0_42, %c0_43] : memref<32x128xf32, #tpu.memory_space<vmem>>, vector<32x128xf32>
    %cst_44 = arith.constant dense<0.000000e+00> : vector<8x128xf32>
    %153 = tpu.matmul %150, %152, %cst_44 {dimension_numbers = #tpu.dot_dimension_numbers<[1], [0], [0], [1], [0, 0, 1, 1], [], []>} : vector<8x32xf32>, vector<32x128xf32>, vector<8x128xf32> -> vector<8x128xf32>
    %154 = arith.addf %151, %153 : vector<8x128xf32>
    %155 = arith.negf %154 : vector<8x128xf32>
    %156 = math.exp %155 : vector<8x128xf32>
    %cst_45 = arith.constant 1.000000e+00 : f32
    %157 = vector.broadcast %cst_45 : f32 to vector<8x128xf32>
    %158 = arith.addf %157, %156 : vector<8x128xf32>
    %159 = arith.divf %157, %158 : vector<8x128xf32>
    %160 = math.tanh %154 : vector<8x128xf32>
    %161 = vector.extract_strided_slice %159 {offsets = [0, 0], sizes = [8, 32], strides = [1, 1]} : vector<8x128xf32> to vector<8x32xf32>
    %162 = vector.extract_strided_slice %159 {offsets = [0, 32], sizes = [8, 32], strides = [1, 1]} : vector<8x128xf32> to vector<8x32xf32>
    %163 = vector.extract_strided_slice %160 {offsets = [0, 64], sizes = [8, 32], strides = [1, 1]} : vector<8x128xf32> to vector<8x32xf32>
    %164 = vector.extract_strided_slice %159 {offsets = [0, 96], sizes = [8, 32], strides = [1, 1]} : vector<8x128xf32> to vector<8x32xf32>
    %165 = arith.mulf %162, %148 : vector<8x32xf32>
    %166 = arith.mulf %161, %163 : vector<8x32xf32>
    %167 = arith.addf %165, %166 : vector<8x32xf32>
    %168 = math.tanh %167 : vector<8x32xf32>
    %169 = arith.mulf %164, %168 : vector<8x32xf32>
    %170 = vector.extract_strided_slice %169 {offsets = [0, 0], sizes = [2, 32], strides = [1, 1]} : vector<8x32xf32> to vector<2x32xf32>
    %c0_46 = arith.constant 0 : index
    %c0_47 = arith.constant 0 : index
    %171 = vector.load %arg6[%c0_46, %c0_47] : memref<32x16xf32, #tpu.memory_space<vmem>>, vector<32x16xf32>
    %cst_48 = arith.constant dense<0.000000e+00> : vector<2x16xf32>
    %172 = tpu.matmul %170, %171, %cst_48 {dimension_numbers = #tpu.dot_dimension_numbers<[1], [0], [0], [1], [0, 0, 1, 1], [], []>} : vector<2x32xf32>, vector<32x16xf32>, vector<2x16xf32> -> vector<2x16xf32>
    %c0_49 = arith.constant 0 : index
    %c0_50 = arith.constant 0 : index
    %173 = vector.load %arg7[%c0_49, %c0_50] : memref<1x16xf32, #tpu.memory_space<vmem>>, vector<1x16xf32>
    %174 = vector.broadcast %173 : vector<1x16xf32> to vector<2x16xf32>
    %175 = arith.addf %172, %174 : vector<2x16xf32>
    %cst_51 = arith.constant 0.000000e+00 : f32
    %176 = vector.broadcast %cst_51 : f32 to vector<2x16xf32>
    %177 = arith.cmpf oge, %175, %176 : vector<2x16xf32>
    %cst_52 = arith.constant 1.000000e-01 : f32
    %178 = vector.broadcast %cst_52 : f32 to vector<2x16xf32>
    %179 = arith.mulf %178, %175 : vector<2x16xf32>
    %180 = arith.select %177, %175, %179 : vector<2x16xi1>, vector<2x16xf32>
    %c0_53 = arith.constant 0 : index
    %c0_54 = arith.constant 0 : index
    %181 = vector.load %arg9[%c0_53, %c0_54] : memref<1x40xf32, #tpu.memory_space<vmem>>, vector<1x40xf32>
    %182 = vector.extract_strided_slice %169 {offsets = [2, 0], sizes = [1, 32], strides = [1, 1]} : vector<8x32xf32> to vector<1x32xf32>
    %c0_55 = arith.constant 0 : index
    %c0_56 = arith.constant 0 : index
    %c0_57 = arith.constant 0 : index
    %183 = vector.load %arg8[%c0_55, %c0_56, %c0_57] : memref<12x32x40xf32, #tpu.memory_space<vmem>>, vector<1x32x40xf32>
    %184 = vector.shape_cast %183 : vector<1x32x40xf32> to vector<32x40xf32>
    %cst_58 = arith.constant dense<0.000000e+00> : vector<1x40xf32>
    %185 = tpu.matmul %182, %184, %cst_58 {dimension_numbers = #tpu.dot_dimension_numbers<[1], [0], [0], [1], [0, 0, 1, 1], [], []>} : vector<1x32xf32>, vector<32x40xf32>, vector<1x40xf32> -> vector<1x40xf32>
    %186 = arith.addf %181, %185 : vector<1x40xf32>
    %187 = vector.extract_strided_slice %169 {offsets = [3, 0], sizes = [1, 32], strides = [1, 1]} : vector<8x32xf32> to vector<1x32xf32>
    %c1 = arith.constant 1 : index
    %c0_59 = arith.constant 0 : index
    %c0_60 = arith.constant 0 : index
    %188 = vector.load %arg8[%c1, %c0_59, %c0_60] : memref<12x32x40xf32, #tpu.memory_space<vmem>>, vector<1x32x40xf32>
    %189 = vector.shape_cast %188 : vector<1x32x40xf32> to vector<32x40xf32>
    %cst_61 = arith.constant dense<0.000000e+00> : vector<1x40xf32>
    %190 = tpu.matmul %187, %189, %cst_61 {dimension_numbers = #tpu.dot_dimension_numbers<[1], [0], [0], [1], [0, 0, 1, 1], [], []>} : vector<1x32xf32>, vector<32x40xf32>, vector<1x40xf32> -> vector<1x40xf32>
    %191 = arith.addf %186, %190 : vector<1x40xf32>
    %192 = vector.extract_strided_slice %169 {offsets = [4, 0], sizes = [1, 32], strides = [1, 1]} : vector<8x32xf32> to vector<1x32xf32>
    %c2 = arith.constant 2 : index
    %c0_62 = arith.constant 0 : index
    %c0_63 = arith.constant 0 : index
    %193 = vector.load %arg8[%c2, %c0_62, %c0_63] : memref<12x32x40xf32, #tpu.memory_space<vmem>>, vector<1x32x40xf32>
    %194 = vector.shape_cast %193 : vector<1x32x40xf32> to vector<32x40xf32>
    %cst_64 = arith.constant dense<0.000000e+00> : vector<1x40xf32>
    %195 = tpu.matmul %192, %194, %cst_64 {dimension_numbers = #tpu.dot_dimension_numbers<[1], [0], [0], [1], [0, 0, 1, 1], [], []>} : vector<1x32xf32>, vector<32x40xf32>, vector<1x40xf32> -> vector<1x40xf32>
    %196 = arith.addf %191, %195 : vector<1x40xf32>
    %197 = vector.extract_strided_slice %169 {offsets = [5, 0], sizes = [1, 32], strides = [1, 1]} : vector<8x32xf32> to vector<1x32xf32>
    %c3 = arith.constant 3 : index
    %c0_65 = arith.constant 0 : index
    %c0_66 = arith.constant 0 : index
    %198 = vector.load %arg8[%c3, %c0_65, %c0_66] : memref<12x32x40xf32, #tpu.memory_space<vmem>>, vector<1x32x40xf32>
    %199 = vector.shape_cast %198 : vector<1x32x40xf32> to vector<32x40xf32>
    %cst_67 = arith.constant dense<0.000000e+00> : vector<1x40xf32>
    %200 = tpu.matmul %197, %199, %cst_67 {dimension_numbers = #tpu.dot_dimension_numbers<[1], [0], [0], [1], [0, 0, 1, 1], [], []>} : vector<1x32xf32>, vector<32x40xf32>, vector<1x40xf32> -> vector<1x40xf32>
    %201 = arith.addf %196, %200 : vector<1x40xf32>
    %202 = vector.extract_strided_slice %169 {offsets = [6, 0], sizes = [1, 32], strides = [1, 1]} : vector<8x32xf32> to vector<1x32xf32>
    %c4 = arith.constant 4 : index
    %c0_68 = arith.constant 0 : index
    %c0_69 = arith.constant 0 : index
    %203 = vector.load %arg8[%c4, %c0_68, %c0_69] : memref<12x32x40xf32, #tpu.memory_space<vmem>>, vector<1x32x40xf32>
    %204 = vector.shape_cast %203 : vector<1x32x40xf32> to vector<32x40xf32>
    %cst_70 = arith.constant dense<0.000000e+00> : vector<1x40xf32>
    %205 = tpu.matmul %202, %204, %cst_70 {dimension_numbers = #tpu.dot_dimension_numbers<[1], [0], [0], [1], [0, 0, 1, 1], [], []>} : vector<1x32xf32>, vector<32x40xf32>, vector<1x40xf32> -> vector<1x40xf32>
    %206 = arith.addf %201, %205 : vector<1x40xf32>
    %207 = vector.extract_strided_slice %169 {offsets = [7, 0], sizes = [1, 32], strides = [1, 1]} : vector<8x32xf32> to vector<1x32xf32>
    %c5 = arith.constant 5 : index
    %c0_71 = arith.constant 0 : index
    %c0_72 = arith.constant 0 : index
    %208 = vector.load %arg8[%c5, %c0_71, %c0_72] : memref<12x32x40xf32, #tpu.memory_space<vmem>>, vector<1x32x40xf32>
    %209 = vector.shape_cast %208 : vector<1x32x40xf32> to vector<32x40xf32>
    %cst_73 = arith.constant dense<0.000000e+00> : vector<1x40xf32>
    %210 = tpu.matmul %207, %209, %cst_73 {dimension_numbers = #tpu.dot_dimension_numbers<[1], [0], [0], [1], [0, 0, 1, 1], [], []>} : vector<1x32xf32>, vector<32x40xf32>, vector<1x40xf32> -> vector<1x40xf32>
    %211 = arith.addf %206, %210 : vector<1x40xf32>
    %c0_74 = arith.constant 0 : index
    %c0_75 = arith.constant 0 : index
    %212 = vector.load %arg17[%c0_74, %c0_75] : memref<2x40xf32, #tpu.memory_space<vmem>>, vector<1x40xf32>
    tpu.vector_store %arg17[%c0_74, %c0_75], %211 {strides = array<i32>} : memref<2x40xf32, #tpu.memory_space<vmem>>, vector<1x40xf32>,
    %c0_76 = arith.constant 0 : index
    %c0_77 = arith.constant 0 : index
    %213 = vector.load %arg9[%c0_76, %c0_77] : memref<1x40xf32, #tpu.memory_space<vmem>>, vector<1x40xf32>
    %214 = vector.extract_strided_slice %169 {offsets = [2, 0], sizes = [1, 32], strides = [1, 1]} : vector<8x32xf32> to vector<1x32xf32>
    %c6 = arith.constant 6 : index
    %c0_78 = arith.constant 0 : index
    %c0_79 = arith.constant 0 : index
    %215 = vector.load %arg8[%c6, %c0_78, %c0_79] : memref<12x32x40xf32, #tpu.memory_space<vmem>>, vector<1x32x40xf32>
    %216 = vector.shape_cast %215 : vector<1x32x40xf32> to vector<32x40xf32>
    %cst_80 = arith.constant dense<0.000000e+00> : vector<1x40xf32>
    %217 = tpu.matmul %214, %216, %cst_80 {dimension_numbers = #tpu.dot_dimension_numbers<[1], [0], [0], [1], [0, 0, 1, 1], [], []>} : vector<1x32xf32>, vector<32x40xf32>, vector<1x40xf32> -> vector<1x40xf32>
    %218 = arith.addf %213, %217 : vector<1x40xf32>
    %219 = vector.extract_strided_slice %169 {offsets = [3, 0], sizes = [1, 32], strides = [1, 1]} : vector<8x32xf32> to vector<1x32xf32>
    %c7 = arith.constant 7 : index
    %c0_81 = arith.constant 0 : index
    %c0_82 = arith.constant 0 : index
    %220 = vector.load %arg8[%c7, %c0_81, %c0_82] : memref<12x32x40xf32, #tpu.memory_space<vmem>>, vector<1x32x40xf32>
    %221 = vector.shape_cast %220 : vector<1x32x40xf32> to vector<32x40xf32>
    %cst_83 = arith.constant dense<0.000000e+00> : vector<1x40xf32>
    %222 = tpu.matmul %219, %221, %cst_83 {dimension_numbers = #tpu.dot_dimension_numbers<[1], [0], [0], [1], [0, 0, 1, 1], [], []>} : vector<1x32xf32>, vector<32x40xf32>, vector<1x40xf32> -> vector<1x40xf32>
    %223 = arith.addf %218, %222 : vector<1x40xf32>
    %224 = vector.extract_strided_slice %169 {offsets = [4, 0], sizes = [1, 32], strides = [1, 1]} : vector<8x32xf32> to vector<1x32xf32>
    %c8 = arith.constant 8 : index
    %c0_84 = arith.constant 0 : index
    %c0_85 = arith.constant 0 : index
    %225 = vector.load %arg8[%c8, %c0_84, %c0_85] : memref<12x32x40xf32, #tpu.memory_space<vmem>>, vector<1x32x40xf32>
    %226 = vector.shape_cast %225 : vector<1x32x40xf32> to vector<32x40xf32>
    %cst_86 = arith.constant dense<0.000000e+00> : vector<1x40xf32>
    %227 = tpu.matmul %224, %226, %cst_86 {dimension_numbers = #tpu.dot_dimension_numbers<[1], [0], [0], [1], [0, 0, 1, 1], [], []>} : vector<1x32xf32>, vector<32x40xf32>, vector<1x40xf32> -> vector<1x40xf32>
    %228 = arith.addf %223, %227 : vector<1x40xf32>
    %229 = vector.extract_strided_slice %169 {offsets = [5, 0], sizes = [1, 32], strides = [1, 1]} : vector<8x32xf32> to vector<1x32xf32>
    %c9 = arith.constant 9 : index
    %c0_87 = arith.constant 0 : index
    %c0_88 = arith.constant 0 : index
    %230 = vector.load %arg8[%c9, %c0_87, %c0_88] : memref<12x32x40xf32, #tpu.memory_space<vmem>>, vector<1x32x40xf32>
    %231 = vector.shape_cast %230 : vector<1x32x40xf32> to vector<32x40xf32>
    %cst_89 = arith.constant dense<0.000000e+00> : vector<1x40xf32>
    %232 = tpu.matmul %229, %231, %cst_89 {dimension_numbers = #tpu.dot_dimension_numbers<[1], [0], [0], [1], [0, 0, 1, 1], [], []>} : vector<1x32xf32>, vector<32x40xf32>, vector<1x40xf32> -> vector<1x40xf32>
    %233 = arith.addf %228, %232 : vector<1x40xf32>
    %234 = vector.extract_strided_slice %169 {offsets = [6, 0], sizes = [1, 32], strides = [1, 1]} : vector<8x32xf32> to vector<1x32xf32>
    %c10 = arith.constant 10 : index
    %c0_90 = arith.constant 0 : index
    %c0_91 = arith.constant 0 : index
    %235 = vector.load %arg8[%c10, %c0_90, %c0_91] : memref<12x32x40xf32, #tpu.memory_space<vmem>>, vector<1x32x40xf32>
    %236 = vector.shape_cast %235 : vector<1x32x40xf32> to vector<32x40xf32>
    %cst_92 = arith.constant dense<0.000000e+00> : vector<1x40xf32>
    %237 = tpu.matmul %234, %236, %cst_92 {dimension_numbers = #tpu.dot_dimension_numbers<[1], [0], [0], [1], [0, 0, 1, 1], [], []>} : vector<1x32xf32>, vector<32x40xf32>, vector<1x40xf32> -> vector<1x40xf32>
    %238 = arith.addf %233, %237 : vector<1x40xf32>
    %239 = vector.extract_strided_slice %169 {offsets = [7, 0], sizes = [1, 32], strides = [1, 1]} : vector<8x32xf32> to vector<1x32xf32>
    %c11 = arith.constant 11 : index
    %c0_93 = arith.constant 0 : index
    %c0_94 = arith.constant 0 : index
    %240 = vector.load %arg8[%c11, %c0_93, %c0_94] : memref<12x32x40xf32, #tpu.memory_space<vmem>>, vector<1x32x40xf32>
    %241 = vector.shape_cast %240 : vector<1x32x40xf32> to vector<32x40xf32>
    %cst_95 = arith.constant dense<0.000000e+00> : vector<1x40xf32>
    %242 = tpu.matmul %239, %241, %cst_95 {dimension_numbers = #tpu.dot_dimension_numbers<[1], [0], [0], [1], [0, 0, 1, 1], [], []>} : vector<1x32xf32>, vector<32x40xf32>, vector<1x40xf32> -> vector<1x40xf32>
    %243 = arith.addf %238, %242 : vector<1x40xf32>
    %c1_96 = arith.constant 1 : index
    %c0_97 = arith.constant 0 : index
    %244 = vector.load %arg17[%c1_96, %c0_97] : memref<2x40xf32, #tpu.memory_space<vmem>>, vector<1x40xf32>
    tpu.vector_store %arg17[%c1_96, %c0_97], %243 {strides = array<i32>} : memref<2x40xf32, #tpu.memory_space<vmem>>, vector<1x40xf32>,
    %c0_98 = arith.constant 0 : index
    %c0_99 = arith.constant 0 : index
    %245 = vector.load %arg17[%c0_98, %c0_99] : memref<2x40xf32, #tpu.memory_space<vmem>>, vector<2x40xf32>
    %cst_100 = arith.constant 0.000000e+00 : f32
    %246 = vector.broadcast %cst_100 : f32 to vector<2x40xf32>
    %247 = arith.cmpf oge, %245, %246 : vector<2x40xf32>
    %cst_101 = arith.constant 1.000000e-01 : f32
    %248 = vector.broadcast %cst_101 : f32 to vector<2x40xf32>
    %249 = arith.mulf %248, %245 : vector<2x40xf32>
    %250 = arith.select %247, %245, %249 : vector<2x40xi1>, vector<2x40xf32>
    %c0_102 = arith.constant 0 : index
    %c0_103 = arith.constant 0 : index
    %251 = vector.load %arg10[%c0_102, %c0_103] : memref<40x128xf32, #tpu.memory_space<vmem>>, vector<40x128xf32>
    %cst_104 = arith.constant dense<0.000000e+00> : vector<2x128xf32>
    %252 = tpu.matmul %250, %251, %cst_104 {dimension_numbers = #tpu.dot_dimension_numbers<[1], [0], [0], [1], [0, 0, 1, 1], [], []>} : vector<2x40xf32>, vector<40x128xf32>, vector<2x128xf32> -> vector<2x128xf32>
    %c0_105 = arith.constant 0 : index
    %c0_106 = arith.constant 0 : index
    %253 = vector.load %arg11[%c0_105, %c0_106] : memref<16x128xf32, #tpu.memory_space<vmem>>, vector<16x128xf32>
    %cst_107 = arith.constant dense<0.000000e+00> : vector<2x128xf32>
    %254 = tpu.matmul %180, %253, %cst_107 {dimension_numbers = #tpu.dot_dimension_numbers<[1], [0], [0], [1], [0, 0, 1, 1], [], []>} : vector<2x16xf32>, vector<16x128xf32>, vector<2x128xf32> -> vector<2x128xf32>
    %255 = arith.addf %252, %254 : vector<2x128xf32>
    %c0_108 = arith.constant 0 : index
    %c0_109 = arith.constant 0 : index
    %256 = vector.load %arg12[%c0_108, %c0_109] : memref<1x128xf32, #tpu.memory_space<vmem>>, vector<1x128xf32>
    %257 = vector.broadcast %256 : vector<1x128xf32> to vector<2x128xf32>
    %258 = arith.addf %255, %257 : vector<2x128xf32>
    %cst_110 = arith.constant 0.000000e+00 : f32
    %259 = vector.broadcast %cst_110 : f32 to vector<2x32xf32>
    %cst_111 = arith.constant 0.000000e+00 : f32
    %260 = vector.broadcast %cst_111 : f32 to vector<2x32xf32>
    %c0_112 = arith.constant 0 : index
    %c0_113 = arith.constant 0 : index
    %261 = vector.load %arg13[%c0_112, %c0_113] : memref<32x128xf32, #tpu.memory_space<vmem>>, vector<32x128xf32>
    %cst_114 = arith.constant dense<0.000000e+00> : vector<2x128xf32>
    %262 = tpu.matmul %259, %261, %cst_114 {dimension_numbers = #tpu.dot_dimension_numbers<[1], [0], [0], [1], [0, 0, 1, 1], [], []>} : vector<2x32xf32>, vector<32x128xf32>, vector<2x128xf32> -> vector<2x128xf32>
    %263 = arith.addf %258, %262 : vector<2x128xf32>
    %264 = arith.negf %263 : vector<2x128xf32>
    %265 = math.exp %264 : vector<2x128xf32>
    %cst_115 = arith.constant 1.000000e+00 : f32
    %266 = vector.broadcast %cst_115 : f32 to vector<2x128xf32>
    %267 = arith.addf %266, %265 : vector<2x128xf32>
    %268 = arith.divf %266, %267 : vector<2x128xf32>
    %269 = math.tanh %263 : vector<2x128xf32>
    %270 = vector.extract_strided_slice %268 {offsets = [0, 0], sizes = [2, 32], strides = [1, 1]} : vector<2x128xf32> to vector<2x32xf32>
    %271 = vector.extract_strided_slice %268 {offsets = [0, 32], sizes = [2, 32], strides = [1, 1]} : vector<2x128xf32> to vector<2x32xf32>
    %272 = vector.extract_strided_slice %269 {offsets = [0, 64], sizes = [2, 32], strides = [1, 1]} : vector<2x128xf32> to vector<2x32xf32>
    %273 = vector.extract_strided_slice %268 {offsets = [0, 96], sizes = [2, 32], strides = [1, 1]} : vector<2x128xf32> to vector<2x32xf32>
    %274 = arith.mulf %271, %260 : vector<2x32xf32>
    %275 = arith.mulf %270, %272 : vector<2x32xf32>
    %276 = arith.addf %274, %275 : vector<2x32xf32>
    %277 = math.tanh %276 : vector<2x32xf32>
    %278 = arith.mulf %273, %277 : vector<2x32xf32>
    %c0_116 = arith.constant 0 : index
    %c0_117 = arith.constant 0 : index
    %279 = vector.load %arg18[%c0_116, %c0_117] : memref<16x32xf32, #tpu.memory_space<vmem>>, vector<2x32xf32>
    tpu.vector_store %arg18[%c0_116, %c0_117], %278 {strides = array<i32>} : memref<16x32xf32, #tpu.memory_space<vmem>>, vector<2x32xf32>,
    %c0_118 = arith.constant 0 : index
    %c0_119 = arith.constant 0 : index
    %280 = vector.load %arg13[%c0_118, %c0_119] : memref<32x128xf32, #tpu.memory_space<vmem>>, vector<32x128xf32>
    %cst_120 = arith.constant dense<0.000000e+00> : vector<2x128xf32>
    %281 = tpu.matmul %278, %280, %cst_120 {dimension_numbers = #tpu.dot_dimension_numbers<[1], [0], [0], [1], [0, 0, 1, 1], [], []>} : vector<2x32xf32>, vector<32x128xf32>, vector<2x128xf32> -> vector<2x128xf32>
    %282 = arith.addf %258, %281 : vector<2x128xf32>
    %283 = arith.negf %282 : vector<2x128xf32>
    %284 = math.exp %283 : vector<2x128xf32>
    %cst_121 = arith.constant 1.000000e+00 : f32
    %285 = vector.broadcast %cst_121 : f32 to vector<2x128xf32>
    %286 = arith.addf %285, %284 : vector<2x128xf32>
    %287 = arith.divf %285, %286 : vector<2x128xf32>
    %288 = math.tanh %282 : vector<2x128xf32>
    %289 = vector.extract_strided_slice %287 {offsets = [0, 0], sizes = [2, 32], strides = [1, 1]} : vector<2x128xf32> to vector<2x32xf32>
    %290 = vector.extract_strided_slice %287 {offsets = [0, 32], sizes = [2, 32], strides = [1, 1]} : vector<2x128xf32> to vector<2x32xf32>
    %291 = vector.extract_strided_slice %288 {offsets = [0, 64], sizes = [2, 32], strides = [1, 1]} : vector<2x128xf32> to vector<2x32xf32>
    %292 = vector.extract_strided_slice %287 {offsets = [0, 96], sizes = [2, 32], strides = [1, 1]} : vector<2x128xf32> to vector<2x32xf32>
    %293 = arith.mulf %290, %276 : vector<2x32xf32>
    %294 = arith.mulf %289, %291 : vector<2x32xf32>
    %295 = arith.addf %293, %294 : vector<2x32xf32>
    %296 = math.tanh %295 : vector<2x32xf32>
    %297 = arith.mulf %292, %296 : vector<2x32xf32>
    %c2_122 = arith.constant 2 : index
    %c0_123 = arith.constant 0 : index
    %298 = vector.load %arg18[%c2_122, %c0_123] : memref<16x32xf32, #tpu.memory_space<vmem>>, vector<2x32xf32>
    tpu.vector_store %arg18[%c2_122, %c0_123], %297 {strides = array<i32>} : memref<16x32xf32, #tpu.memory_space<vmem>>, vector<2x32xf32>,
    %c0_124 = arith.constant 0 : index
    %c0_125 = arith.constant 0 : index
    %299 = vector.load %arg13[%c0_124, %c0_125] : memref<32x128xf32, #tpu.memory_space<vmem>>, vector<32x128xf32>
    %cst_126 = arith.constant dense<0.000000e+00> : vector<2x128xf32>
    %300 = tpu.matmul %297, %299, %cst_126 {dimension_numbers = #tpu.dot_dimension_numbers<[1], [0], [0], [1], [0, 0, 1, 1], [], []>} : vector<2x32xf32>, vector<32x128xf32>, vector<2x128xf32> -> vector<2x128xf32>
    %301 = arith.addf %258, %300 : vector<2x128xf32>
    %302 = arith.negf %301 : vector<2x128xf32>
    %303 = math.exp %302 : vector<2x128xf32>
    %cst_127 = arith.constant 1.000000e+00 : f32
    %304 = vector.broadcast %cst_127 : f32 to vector<2x128xf32>
    %305 = arith.addf %304, %303 : vector<2x128xf32>
    %306 = arith.divf %304, %305 : vector<2x128xf32>
    %307 = math.tanh %301 : vector<2x128xf32>
    %308 = vector.extract_strided_slice %306 {offsets = [0, 0], sizes = [2, 32], strides = [1, 1]} : vector<2x128xf32> to vector<2x32xf32>
    %309 = vector.extract_strided_slice %306 {offsets = [0, 32], sizes = [2, 32], strides = [1, 1]} : vector<2x128xf32> to vector<2x32xf32>
    %310 = vector.extract_strided_slice %307 {offsets = [0, 64], sizes = [2, 32], strides = [1, 1]} : vector<2x128xf32> to vector<2x32xf32>
    %311 = vector.extract_strided_slice %306 {offsets = [0, 96], sizes = [2, 32], strides = [1, 1]} : vector<2x128xf32> to vector<2x32xf32>
    %312 = arith.mulf %309, %295 : vector<2x32xf32>
    %313 = arith.mulf %308, %310 : vector<2x32xf32>
    %314 = arith.addf %312, %313 : vector<2x32xf32>
    %315 = math.tanh %314 : vector<2x32xf32>
    %316 = arith.mulf %311, %315 : vector<2x32xf32>
    %c4_128 = arith.constant 4 : index
    %c0_129 = arith.constant 0 : index
    %317 = vector.load %arg18[%c4_128, %c0_129] : memref<16x32xf32, #tpu.memory_space<vmem>>, vector<2x32xf32>
    tpu.vector_store %arg18[%c4_128, %c0_129], %316 {strides = array<i32>} : memref<16x32xf32, #tpu.memory_space<vmem>>, vector<2x32xf32>,
    %c0_130 = arith.constant 0 : index
    %c0_131 = arith.constant 0 : index
    %318 = vector.load %arg13[%c0_130, %c0_131] : memref<32x128xf32, #tpu.memory_space<vmem>>, vector<32x128xf32>
    %cst_132 = arith.constant dense<0.000000e+00> : vector<2x128xf32>
    %319 = tpu.matmul %316, %318, %cst_132 {dimension_numbers = #tpu.dot_dimension_numbers<[1], [0], [0], [1], [0, 0, 1, 1], [], []>} : vector<2x32xf32>, vector<32x128xf32>, vector<2x128xf32> -> vector<2x128xf32>
    %320 = arith.addf %258, %319 : vector<2x128xf32>
    %321 = arith.negf %320 : vector<2x128xf32>
    %322 = math.exp %321 : vector<2x128xf32>
    %cst_133 = arith.constant 1.000000e+00 : f32
    %323 = vector.broadcast %cst_133 : f32 to vector<2x128xf32>
    %324 = arith.addf %323, %322 : vector<2x128xf32>
    %325 = arith.divf %323, %324 : vector<2x128xf32>
    %326 = math.tanh %320 : vector<2x128xf32>
    %327 = vector.extract_strided_slice %325 {offsets = [0, 0], sizes = [2, 32], strides = [1, 1]} : vector<2x128xf32> to vector<2x32xf32>
    %328 = vector.extract_strided_slice %325 {offsets = [0, 32], sizes = [2, 32], strides = [1, 1]} : vector<2x128xf32> to vector<2x32xf32>
    %329 = vector.extract_strided_slice %326 {offsets = [0, 64], sizes = [2, 32], strides = [1, 1]} : vector<2x128xf32> to vector<2x32xf32>
    %330 = vector.extract_strided_slice %325 {offsets = [0, 96], sizes = [2, 32], strides = [1, 1]} : vector<2x128xf32> to vector<2x32xf32>
    %331 = arith.mulf %328, %314 : vector<2x32xf32>
    %332 = arith.mulf %327, %329 : vector<2x32xf32>
    %333 = arith.addf %331, %332 : vector<2x32xf32>
    %334 = math.tanh %333 : vector<2x32xf32>
    %335 = arith.mulf %330, %334 : vector<2x32xf32>
    %c6_134 = arith.constant 6 : index
    %c0_135 = arith.constant 0 : index
    %336 = vector.load %arg18[%c6_134, %c0_135] : memref<16x32xf32, #tpu.memory_space<vmem>>, vector<2x32xf32>
    tpu.vector_store %arg18[%c6_134, %c0_135], %335 {strides = array<i32>} : memref<16x32xf32, #tpu.memory_space<vmem>>, vector<2x32xf32>,
    %c0_136 = arith.constant 0 : index
    %c0_137 = arith.constant 0 : index
    %337 = vector.load %arg13[%c0_136, %c0_137] : memref<32x128xf32, #tpu.memory_space<vmem>>, vector<32x128xf32>
    %cst_138 = arith.constant dense<0.000000e+00> : vector<2x128xf32>
    %338 = tpu.matmul %335, %337, %cst_138 {dimension_numbers = #tpu.dot_dimension_numbers<[1], [0], [0], [1], [0, 0, 1, 1], [], []>} : vector<2x32xf32>, vector<32x128xf32>, vector<2x128xf32> -> vector<2x128xf32>
    %339 = arith.addf %258, %338 : vector<2x128xf32>
    %340 = arith.negf %339 : vector<2x128xf32>
    %341 = math.exp %340 : vector<2x128xf32>
    %cst_139 = arith.constant 1.000000e+00 : f32
    %342 = vector.broadcast %cst_139 : f32 to vector<2x128xf32>
    %343 = arith.addf %342, %341 : vector<2x128xf32>
    %344 = arith.divf %342, %343 : vector<2x128xf32>
    %345 = math.tanh %339 : vector<2x128xf32>
    %346 = vector.extract_strided_slice %344 {offsets = [0, 0], sizes = [2, 32], strides = [1, 1]} : vector<2x128xf32> to vector<2x32xf32>
    %347 = vector.extract_strided_slice %344 {offsets = [0, 32], sizes = [2, 32], strides = [1, 1]} : vector<2x128xf32> to vector<2x32xf32>
    %348 = vector.extract_strided_slice %345 {offsets = [0, 64], sizes = [2, 32], strides = [1, 1]} : vector<2x128xf32> to vector<2x32xf32>
    %349 = vector.extract_strided_slice %344 {offsets = [0, 96], sizes = [2, 32], strides = [1, 1]} : vector<2x128xf32> to vector<2x32xf32>
    %350 = arith.mulf %347, %333 : vector<2x32xf32>
    %351 = arith.mulf %346, %348 : vector<2x32xf32>
    %352 = arith.addf %350, %351 : vector<2x32xf32>
    %353 = math.tanh %352 : vector<2x32xf32>
    %354 = arith.mulf %349, %353 : vector<2x32xf32>
    %c8_140 = arith.constant 8 : index
    %c0_141 = arith.constant 0 : index
    %355 = vector.load %arg18[%c8_140, %c0_141] : memref<16x32xf32, #tpu.memory_space<vmem>>, vector<2x32xf32>
    tpu.vector_store %arg18[%c8_140, %c0_141], %354 {strides = array<i32>} : memref<16x32xf32, #tpu.memory_space<vmem>>, vector<2x32xf32>,
    %c0_142 = arith.constant 0 : index
    %c0_143 = arith.constant 0 : index
    %356 = vector.load %arg13[%c0_142, %c0_143] : memref<32x128xf32, #tpu.memory_space<vmem>>, vector<32x128xf32>
    %cst_144 = arith.constant dense<0.000000e+00> : vector<2x128xf32>
    %357 = tpu.matmul %354, %356, %cst_144 {dimension_numbers = #tpu.dot_dimension_numbers<[1], [0], [0], [1], [0, 0, 1, 1], [], []>} : vector<2x32xf32>, vector<32x128xf32>, vector<2x128xf32> -> vector<2x128xf32>
    %358 = arith.addf %258, %357 : vector<2x128xf32>
    %359 = arith.negf %358 : vector<2x128xf32>
    %360 = math.exp %359 : vector<2x128xf32>
    %cst_145 = arith.constant 1.000000e+00 : f32
    %361 = vector.broadcast %cst_145 : f32 to vector<2x128xf32>
    %362 = arith.addf %361, %360 : vector<2x128xf32>
    %363 = arith.divf %361, %362 : vector<2x128xf32>
    %364 = math.tanh %358 : vector<2x128xf32>
    %365 = vector.extract_strided_slice %363 {offsets = [0, 0], sizes = [2, 32], strides = [1, 1]} : vector<2x128xf32> to vector<2x32xf32>
    %366 = vector.extract_strided_slice %363 {offsets = [0, 32], sizes = [2, 32], strides = [1, 1]} : vector<2x128xf32> to vector<2x32xf32>
    %367 = vector.extract_strided_slice %364 {offsets = [0, 64], sizes = [2, 32], strides = [1, 1]} : vector<2x128xf32> to vector<2x32xf32>
    %368 = vector.extract_strided_slice %363 {offsets = [0, 96], sizes = [2, 32], strides = [1, 1]} : vector<2x128xf32> to vector<2x32xf32>
    %369 = arith.mulf %366, %352 : vector<2x32xf32>
    %370 = arith.mulf %365, %367 : vector<2x32xf32>
    %371 = arith.addf %369, %370 : vector<2x32xf32>
    %372 = math.tanh %371 : vector<2x32xf32>
    %373 = arith.mulf %368, %372 : vector<2x32xf32>
    %c10_146 = arith.constant 10 : index
    %c0_147 = arith.constant 0 : index
    %374 = vector.load %arg18[%c10_146, %c0_147] : memref<16x32xf32, #tpu.memory_space<vmem>>, vector<2x32xf32>
    tpu.vector_store %arg18[%c10_146, %c0_147], %373 {strides = array<i32>} : memref<16x32xf32, #tpu.memory_space<vmem>>, vector<2x32xf32>,
    %c0_148 = arith.constant 0 : index
    %c0_149 = arith.constant 0 : index
    %375 = vector.load %arg13[%c0_148, %c0_149] : memref<32x128xf32, #tpu.memory_space<vmem>>, vector<32x128xf32>
    %cst_150 = arith.constant dense<0.000000e+00> : vector<2x128xf32>
    %376 = tpu.matmul %373, %375, %cst_150 {dimension_numbers = #tpu.dot_dimension_numbers<[1], [0], [0], [1], [0, 0, 1, 1], [], []>} : vector<2x32xf32>, vector<32x128xf32>, vector<2x128xf32> -> vector<2x128xf32>
    %377 = arith.addf %258, %376 : vector<2x128xf32>
    %378 = arith.negf %377 : vector<2x128xf32>
    %379 = math.exp %378 : vector<2x128xf32>
    %cst_151 = arith.constant 1.000000e+00 : f32
    %380 = vector.broadcast %cst_151 : f32 to vector<2x128xf32>
    %381 = arith.addf %380, %379 : vector<2x128xf32>
    %382 = arith.divf %380, %381 : vector<2x128xf32>
    %383 = math.tanh %377 : vector<2x128xf32>
    %384 = vector.extract_strided_slice %382 {offsets = [0, 0], sizes = [2, 32], strides = [1, 1]} : vector<2x128xf32> to vector<2x32xf32>
    %385 = vector.extract_strided_slice %382 {offsets = [0, 32], sizes = [2, 32], strides = [1, 1]} : vector<2x128xf32> to vector<2x32xf32>
    %386 = vector.extract_strided_slice %383 {offsets = [0, 64], sizes = [2, 32], strides = [1, 1]} : vector<2x128xf32> to vector<2x32xf32>
    %387 = vector.extract_strided_slice %382 {offsets = [0, 96], sizes = [2, 32], strides = [1, 1]} : vector<2x128xf32> to vector<2x32xf32>
    %388 = arith.mulf %385, %371 : vector<2x32xf32>
    %389 = arith.mulf %384, %386 : vector<2x32xf32>
    %390 = arith.addf %388, %389 : vector<2x32xf32>
    %391 = math.tanh %390 : vector<2x32xf32>
    %392 = arith.mulf %387, %391 : vector<2x32xf32>
    %c12 = arith.constant 12 : index
    %c0_152 = arith.constant 0 : index
    %393 = vector.load %arg18[%c12, %c0_152] : memref<16x32xf32, #tpu.memory_space<vmem>>, vector<2x32xf32>
    tpu.vector_store %arg18[%c12, %c0_152], %392 {strides = array<i32>} : memref<16x32xf32, #tpu.memory_space<vmem>>, vector<2x32xf32>,
    %c0_153 = arith.constant 0 : index
    %c0_154 = arith.constant 0 : index
    %394 = vector.load %arg13[%c0_153, %c0_154] : memref<32x128xf32, #tpu.memory_space<vmem>>, vector<32x128xf32>
    %cst_155 = arith.constant dense<0.000000e+00> : vector<2x128xf32>
    %395 = tpu.matmul %392, %394, %cst_155 {dimension_numbers = #tpu.dot_dimension_numbers<[1], [0], [0], [1], [0, 0, 1, 1], [], []>} : vector<2x32xf32>, vector<32x128xf32>, vector<2x128xf32> -> vector<2x128xf32>
    %396 = arith.addf %258, %395 : vector<2x128xf32>
    %397 = arith.negf %396 : vector<2x128xf32>
    %398 = math.exp %397 : vector<2x128xf32>
    %cst_156 = arith.constant 1.000000e+00 : f32
    %399 = vector.broadcast %cst_156 : f32 to vector<2x128xf32>
    %400 = arith.addf %399, %398 : vector<2x128xf32>
    %401 = arith.divf %399, %400 : vector<2x128xf32>
    %402 = math.tanh %396 : vector<2x128xf32>
    %403 = vector.extract_strided_slice %401 {offsets = [0, 0], sizes = [2, 32], strides = [1, 1]} : vector<2x128xf32> to vector<2x32xf32>
    %404 = vector.extract_strided_slice %401 {offsets = [0, 32], sizes = [2, 32], strides = [1, 1]} : vector<2x128xf32> to vector<2x32xf32>
    %405 = vector.extract_strided_slice %402 {offsets = [0, 64], sizes = [2, 32], strides = [1, 1]} : vector<2x128xf32> to vector<2x32xf32>
    %406 = vector.extract_strided_slice %401 {offsets = [0, 96], sizes = [2, 32], strides = [1, 1]} : vector<2x128xf32> to vector<2x32xf32>
    %407 = arith.mulf %404, %390 : vector<2x32xf32>
    %408 = arith.mulf %403, %405 : vector<2x32xf32>
    %409 = arith.addf %407, %408 : vector<2x32xf32>
    %410 = math.tanh %409 : vector<2x32xf32>
    %411 = arith.mulf %406, %410 : vector<2x32xf32>
    %c14 = arith.constant 14 : index
    %c0_157 = arith.constant 0 : index
    %412 = vector.load %arg18[%c14, %c0_157] : memref<16x32xf32, #tpu.memory_space<vmem>>, vector<2x32xf32>
    tpu.vector_store %arg18[%c14, %c0_157], %411 {strides = array<i32>} : memref<16x32xf32, #tpu.memory_space<vmem>>, vector<2x32xf32>,
    %c0_158 = arith.constant 0 : index
    %c0_159 = arith.constant 0 : index
    %413 = vector.load %arg18[%c0_158, %c0_159] : memref<16x32xf32, #tpu.memory_space<vmem>>, vector<16x32xf32>
    %c0_160 = arith.constant 0 : index
    %c0_161 = arith.constant 0 : index
    %414 = vector.load %arg14[%c0_160, %c0_161] : memref<32x5xf32, #tpu.memory_space<vmem>>, vector<32x5xf32>
    %cst_162 = arith.constant dense<0.000000e+00> : vector<16x5xf32>
    %415 = tpu.matmul %413, %414, %cst_162 {dimension_numbers = #tpu.dot_dimension_numbers<[1], [0], [0], [1], [0, 0, 1, 1], [], []>} : vector<16x32xf32>, vector<32x5xf32>, vector<16x5xf32> -> vector<16x5xf32>
    %c0_163 = arith.constant 0 : index
    %c0_164 = arith.constant 0 : index
    %416 = vector.load %arg15[%c0_163, %c0_164] : memref<1x5xf32, #tpu.memory_space<vmem>>, vector<1x5xf32>
    %417 = vector.broadcast %416 : vector<1x5xf32> to vector<16x5xf32>
    %418 = arith.addf %415, %417 : vector<16x5xf32>
    %419 = tpu.iota {dimensions = array<i32: 1>} : vector<16x5xi32>
    %c2_i32 = arith.constant 2 : i32
    %420 = vector.broadcast %c2_i32 : i32 to vector<16x5xi32>
    %421 = arith.cmpi slt, %419, %420 : vector<16x5xi32>
    %c4_i32 = arith.constant 4 : i32
    %422 = vector.broadcast %c4_i32 : i32 to vector<16x5xi32>
    %423 = arith.cmpi slt, %419, %422 : vector<16x5xi32>
    %424 = math.exp %418 : vector<16x5xf32>
    %425 = math.tanh %418 : vector<16x5xf32>
    %426 = arith.select %423, %424, %425 : vector<16x5xi1>, vector<16x5xf32>
    %427 = arith.select %421, %418, %426 : vector<16x5xi1>, vector<16x5xf32>
    %c0_165 = arith.constant 0 : index
    %c0_166 = arith.constant 0 : index
    %428 = vector.load %arg16[%c0_165, %c0_166] : memref<16x5xf32, #tpu.memory_space<vmem>>, vector<16x5xf32>
    tpu.vector_store %arg16[%c0_165, %c0_166], %427 {strides = array<i32>} : memref<16x5xf32, #tpu.memory_space<vmem>>, vector<16x5xf32>,
    return
  }
}

</mosaic_0001>

<bundles_post_ra>
// kernel: slstm_forward.1
= control target key start
LH: loop header
LB: loop body
LE: loop exit
PB: predicated region body
PF: predicated region fallthrough
CT: control target
= control target key end

     0   :  { %vm94_vm0 = vcmask 1041408   ;;  %vm69_vm1 = vcmask 15360   ;;  %v4362_v6 = vmov 0.0|0.0   ;;  %vm4363_vm2 = vmmov 0   ;;  %s4365_s22 = smov 64   ;;  %s5053_s1 = inlined_call_operand.vmem [shape: f32[2,16], index: 1, kind: input, shape index: {}]   ;;  %s5054_s0 = inlined_call_operand.vmem [shape: f32[64,2], index: 0, kind: input, shape index: {}]   ;;  %s5055_s4 = inlined_call_operand.vmem [shape: f32[32,128], index: 4, kind: input, shape index: {}]   ;;  %s5056_s3 = inlined_call_operand.vmem [shape: f32[16,128], index: 3, kind: input, shape index: {}]   ;;  %s5057_s2 = inlined_call_operand.vmem [shape: f32[1,16], index: 2, kind: input, shape index: {}]   ;;  %s5058_s5 = inlined_call_operand.vmem [shape: f32[1,128], index: 5, kind: input, shape index: {}]   ;;  %s5059_s6 = inlined_call_operand.vmem [shape: f32[32,16], index: 6, kind: input, shape index: {}]   ;;  %s5060_s8 = inlined_call_operand.vmem [shape: f32[12,32,40], index: 8, kind: input, shape index: {}]   ;;  %s5061_s11 = inlined_call_operand.vmem [shape: f32[16,128], index: 11, kind: input, shape index: {}]   ;;  %s5062_s13 = inlined_call_operand.vmem [shape: f32[32,128], index: 13, kind: input, shape index: {}]   ;;  %s5063_s7 = inlined_call_operand.vmem [shape: f32[1,16], index: 7, kind: input, shape index: {}]   ;;  %s5064_s10 = inlined_call_operand.vmem [shape: f32[40,128], index: 10, kind: input, shape index: {}]   ;;  %s5065_s9 = inlined_call_operand.vmem [shape: f32[1,40], index: 9, kind: input, shape index: {}]   ;;  %s5066_s12 = inlined_call_operand.vmem [shape: f32[1,128], index: 12, kind: input, shape index: {}]   ;;  %s5067_s14 = inlined_call_operand.vmem [shape: f32[32,5], index: 14, kind: input, shape index: {}]   ;;  %s5068_s15 = inlined_call_operand.vmem [shape: f32[1,5], index: 15, kind: input, shape index: {}]   ;;  %s5069_s16 = inlined_call_operand.vmem [shape: f32[16,5], index: 16, kind: output, shape index: {}]  }
   0x1   :  { %5070 = sst [smem:[#allocation4_spill]] %s5053_s1  ;;  %v53_v1 = vld [vmem:[%s5054_s0] sm:$0xff]  ;;  %v54_v2 = vld [vmem:[%s5054_s0 + $0x8] sm:$0xff]  ;;  %v55_v3 = vld [vmem:[%s5054_s0 + $0x10] sm:$0xff]  ;;  %v4364_v19 = vmov 0.0   ;;  %vm236_vm5 = vcmask 130048  }
   0x2   :  { %s5071_s23 = sld [smem:[#allocation4_spill]]  ;;  %3626 = vmatprep.mubr.msk.f32.mxu0 %vm69_vm1, %v53_v1  ;;  %v366_v4 = vld [vmem:[%s5055_s4] sm:$0xff]  ;;  %v367_v5 = vld [vmem:[%s5055_s4 + $0x8] sm:$0xff]  ;;  %v56_v8 = vld [vmem:[%s5054_s0 + $0x18] sm:$0xff]  ;;  %vm370_vm12 = vcmask 261120   ;;  %vm1744_vm14 = vcmask 319488  }
   0x3   :  { %v4473_v7 = vpack.c.bf16 %v367_v5, %v366_v4  ;;  %v57_v9 = vld [vmem:[%s5054_s0 + $0x20] sm:$0xff]  ;;  %v58_v10 = vld [vmem:[%s5054_s0 + $0x28] sm:$0xff]  ;;  %v59_v11 = vld [vmem:[%s5054_s0 + $0x30] sm:$0xff] }
   0x4   :  { %v60_v12 = vld [vmem:[%s5054_s0 + $0x38] sm:$0xff]  ;;  %v227_v13 = vld [vmem:[%s5056_s3] sm:$0xff]  ;;  %v228_v14 = vld [vmem:[%s5056_s3 + $0x8] sm:$0xff] }
   0x5   :  { %v4004_v15 = vpack.c.bf16 %v228_v14, %v227_v13  ;;  %v368_v16 = vld [vmem:[%s5055_s4 + $0x10] sm:$0xff]  ;;  %v369_v17 = vld [vmem:[%s5055_s4 + $0x18] sm:$0xff]  ;;  %v3332_v20 = vld [vmem:[%s5057_s2] ss:$0 sm:$0xff] }
   0x6   :  { %v4510_v18 = vpack.c.bf16 %v369_v17, %v368_v16  ;;  %v4544_v55 = vld [vmem:[%s5058_s5] ss:$0 sm:$0xff]  ;;  %s4366_s5 = smov 32  }
   0x7   :  { %4005 = vmatprep.subr.bf16.mxu1 %v4004_v15 }
   0x8   :  { %v61_v0 = vld [vmem:[%s5071_s23] sm:$0x3]  ;;  %4007 = vmatpush3.bf16.msra.mxu1 %v4004_v15 }
   0x9   :  { %3624 = vmatprep.subr.msk.mxu0 %vm94_vm0, %v61_v0  ;;  %4014 = vmatprep.subr.bf16.mxu1 %v4362_v6 }
   0xa   :  { %3625 = vmatpush3.msk.msra.mxu0 %vm94_vm0, %v61_v0  ;;  %vm2288_vm0 = vcmask 326656  }
   0xb   :  { %3627 = vmatmul.mubr.msk.f32.vlgmr.msra.gmra.mrb[0].mxu0 %vm69_vm1, %v54_v2  ;;  %4008 = vmatprep.subr.bf16.mxu0 %v4362_v6 }
   0xc   :  { %3629 = vmatprep.mubr.msk.f32.mxu0 %vm69_vm1, %v55_v3  ;;  %4010 = vmatpush3.bf16.msra.mxu0 %v4473_v7 }
   0xd   :  { %4011 = vmatprep.subr.bf16.mxu0 %v4362_v6 }
   0xf   :  { %3630 = vmatmul.mubr.msk.f32.gmra.mrb[2].mxu0 %vm69_vm1, %v56_v8 }
  0x10   :  { %3632 = vmatprep.mubr.msk.f32.mxu0 %vm69_vm1, %v57_v9  ;;  %4013 = vmatpush3.bf16.msra.mxu0 %v4510_v18 }
  0x11   :  { %4020 = vmatprep.subr.bf16.mxu0 %v4362_v6 }
  0x13   :  { %3633 = vmatmul.mubr.msk.f32.gmra.mrb[4].mxu0 %vm69_vm1, %v58_v10 }
  0x14   :  { %3635 = vmatprep.mubr.msk.f32.mxu0 %vm69_vm1, %v59_v11 }
  0x17   :  { %3636 = vmatmul.mubr.msk.f32.gmra.mrb[6].mxu0 %vm69_vm1, %v60_v12  ;;  %vm2473_vm1 = vcmask 254976  }
  0x18   :  { %3662 = vmatprep.mubr.msk.f32.mxu0 %vm4363_vm2, %v4364_v19 }
  0x1b   :  { %3663 = vmatmul.mubr.f32.vlgmr.msra.gmra.mrb[8].mxu0 %v4364_v19 }
  0x1c   :  { %4022 = vmatpush3.bf16.msra.mxu0 %v4473_v7  ;;  %3684 = vmatprep.mubr.msk.f32.mxu0 %vm4363_vm2, %v4364_v19 }
  0x1d   :  { %4023 = vmatprep.subr.bf16.mxu0 %v4362_v6 }
  0x20   :  { %4025 = vmatpush3.bf16.msra.mxu0 %v4510_v18 }
  0x21   :  { %4032 = vmatprep.subr.bf16.mxu0 %v4362_v6 }
  0xde   :  { %v3628_v21 = vpop.f32.mrb[0].mxu0 }
  0xdf   :  { %v170_v22 = vadd.f32 %v3628_v21, %v3332_v20  ;;  %v164_v23 = vpop.f32.mrb[1].mxu0 }
  0xe0   :  { %v165_v24 = vadd.f32 %v3332_v20, %v164_v23 }
  0xe1   :  { %v212_v25 = vmul.f32 0.1, %v170_v22  ;;  %vm204_vm3 = vcmp.ge.f32.partialorder %v170_v22, 0.0 }
  0xe2   :  { %vm203_vm4 = vcmp.ge.f32.partialorder %v165_v24, 0.0  ;;  %v211_v26 = vmul.f32 0.1, %v165_v24  ;;  %v3631_v27 = vpop.f32.mrb[2].mxu0 }
  0xe3   :  { %v180_v28 = vadd.f32 %v3631_v27, %v3332_v20  ;;  %v174_v29 = vpop.f32.mrb[3].mxu0  ;;  %v220_v32 = vsel %vm204_vm3, %v170_v22, %v212_v25 }
  0xe4   :  { %v219_v30 = vsel %vm203_vm4, %v165_v24, %v211_v26  ;;  %v175_v31 = vadd.f32 %v3332_v20, %v174_v29  ;;  %vm3325_vm4 = vcmask 39936  }
  0xe5   :  { %3642 = vmatprep.mubr.msk.f32.mxu1 %vm236_vm5, %v219_v30  ;;  %vm206_vm6 = vcmp.ge.f32.partialorder %v180_v28, 0.0  ;;  %v214_v33 = vmul.f32 0.1, %v180_v28 }
  0xe6   :  { %3643 = vmatmul.mubr.msk.f32.vlgmr.msra.gmra.mrb[0].mxu1 %vm236_vm5, %v220_v32  ;;  %vm205_vm7 = vcmp.ge.f32.partialorder %v175_v31, 0.0  ;;  %v213_v34 = vmul.f32 0.1, %v175_v31  ;;  %v3634_v35 = vpop.f32.mrb[4].mxu0 }
  0xe7   :  { %v190_v36 = vadd.f32 %v3634_v35, %v3332_v20  ;;  %v184_v37 = vpop.f32.mrb[5].mxu0  ;;  %v222_v38 = vsel %vm206_vm6, %v180_v28, %v214_v33  ;;  %4016 = vmatpush3.bf16.msra.mxu1 %v4473_v7 }
  0xe8   :  { %v185_v39 = vadd.f32 %v3332_v20, %v184_v37  ;;  %v221_v40 = vsel %vm205_vm7, %v175_v31, %v213_v34  ;;  %4017 = vmatprep.subr.bf16.mxu1 %v4362_v6 }
  0xe9   :  { %vm208_vm8 = vcmp.ge.f32.partialorder %v190_v36, 0.0  ;;  %v216_v41 = vmul.f32 0.1, %v190_v36  ;;  %3645 = vmatprep.mubr.msk.f32.mxu1 %vm236_vm5, %v221_v40 }
  0xea   :  { %vm207_vm9 = vcmp.ge.f32.partialorder %v185_v39, 0.0  ;;  %v215_v42 = vmul.f32 0.1, %v185_v39  ;;  %3646 = vmatmul.mubr.msk.f32.gmra.mrb[2].mxu1 %vm236_vm5, %v222_v38  ;;  %v3637_v45 = vpop.f32.mrb[6].mxu0 }
  0xeb   :  { %v224_v43 = vsel %vm208_vm8, %v190_v36, %v216_v41  ;;  %4019 = vmatpush3.bf16.msra.mxu1 %v4510_v18  ;;  %v200_v46 = vadd.f32 %v3637_v45, %v3332_v20  ;;  %v194_v47 = vpop.f32.mrb[7].mxu0 }
  0xec   :  { %v223_v44 = vsel %vm207_vm9, %v185_v39, %v215_v42  ;;  %4026 = vmatprep.subr.bf16.mxu1 %v4362_v6  ;;  %v195_v48 = vadd.f32 %v3332_v20, %v194_v47 }
  0xed   :  { %3648 = vmatprep.mubr.msk.f32.mxu1 %vm236_vm5, %v223_v44  ;;  %v218_v49 = vmul.f32 0.1, %v200_v46  ;;  %vm210_vm10 = vcmp.ge.f32.partialorder %v200_v46, 0.0 }
  0xee   :  { %3649 = vmatmul.mubr.msk.f32.gmra.mrb[4].mxu1 %vm236_vm5, %v224_v43  ;;  %vm209_vm11 = vcmp.ge.f32.partialorder %v195_v48, 0.0  ;;  %v217_v50 = vmul.f32 0.1, %v195_v48  ;;  %v440_v53 = vpop.f32.mrb[8].mxu0 }
  0xef   :  { %v226_v52 = vsel %vm210_vm10, %v200_v46, %v218_v49  ;;  %v3664_v54 = vpop.f32.mrb[9].mxu0 }
  0xf0   :  { %v225_v51 = vsel %vm209_vm11, %v195_v48, %v217_v50 }
  0xf1   :  { %3651 = vmatprep.mubr.msk.f32.mxu1 %vm236_vm5, %v225_v51 }
  0xf2   :  { %3652 = vmatmul.mubr.msk.f32.gmra.mrb[6].mxu1 %vm236_vm5, %v226_v52 }
  0xf3   :  { %3673 = vmatprep.mubr.msk.f32.mxu1 %vm4363_vm2, %v4364_v19 }
 0x1b9   :  { %v3644_v56 = vpop.f32.mrb[0].mxu1 }
 0x1ba   :  { %v327_v57 = vpop.f32.mrb[1].mxu1  ;;  %v333_v20 = vadd.f32 %v3644_v56, %v4544_v55 }
 0x1bb   :  { %v328_v58 = vadd.f32 %v4544_v55, %v327_v57 }
 0x1bd   :  { %v444_v59 = vadd.f32 %v440_v53, %v328_v58  ;;  %v4547_v60 = vpop.f32.mrb[2].mxu1 }
 0x1be   :  { %v4549_v61 = vpop.f32.mrb[3].mxu1  ;;  %v343_v57 = vadd.f32 %v4547_v60, %v4544_v55 }
 0x1bf   :  { %4226 = vtanh.f32 %v444_v59  ;;  %v3351_v3 = vmul.f32 -1.442695, %v444_v59  ;;  %v338_v38 = vadd.f32 %v4544_v55, %v4549_v61 }
 0x1c1   :  { %v4551_v62 = vpop.f32.mrb[4].mxu1  ;;  %4228 = vpow2.f32 %v3351_v3 }
 0x1c2   :  { %v4553_v63 = vpop.f32.mrb[5].mxu1 }
 0x1c5   :  { %v4556_v1 = vpop.f32.mrb[6].mxu1 }
 0x1c6   :  { %v4558_v2 = vpop.f32.mrb[7].mxu1 }
 0x1c9   :  { %v4227_v0 = vpop.eup %4226 }
 0x1ca   :  { %454 = vrot.lane.b32.xlu0 %v4227_v0, %s4365_s22 }
 0x1cb   :  { %v4229_v4 = vpop.eup %4228 }
 0x1cc   :  { %v448_v5 = vadd.f32 1.0, %v4229_v4 }
 0x1ce   :  { %4230 = vrcp.f32 %v448_v5 }
 0x1d8   :  { %v4231_v8 = vpop.eup %4230 }
 0x1d9   :  { %v452_v11 = vmul.f32 0.0, %v4231_v8 }
 0x23c   :  { %v455_v9 = vpop.permute.xlu0 %454 }
 0x23d   :  { %v457_v10 = vmul.f32 %v4231_v8, %v455_v9 }
 0x23f   :  { %459 = vrot.lane.b32.xlu0 %v457_v10, %s4366_s5 }
 0x2b1   :  { %v460_v12 = vpop.permute.xlu0 %459 }
 0x2b2   :  { %v462_v13 = vadd.f32 %v460_v12, %v452_v11 }
 0x2b4   :  { %4232 = vtanh.f32 %v462_v13 }
 0x2be   :  { %v4233_v14 = vpop.eup %4232 }
 0x2bf   :  { %465 = vrot.lane.b32.xlu1 %v4233_v14, %s4365_s22 }
 0x331   :  { %v466_v15 = vpop.permute.xlu1 %465 }
 0x332   :  { %v468_v16 = vmul.f32 %v4231_v8, %v466_v15 }
 0x334   :  { %470 = vrot.lane.b32.xlu1 %v468_v16, %s4366_s5 }
 0x3a6   :  { %v471_v17 = vpop.permute.xlu1 %470 }
 0x3a7   :  { %3674 = vmatmul.mubr.msk.f32.vlgmr.msra.gmra.mrb[8].mxu1 %vm370_vm12, %v471_v17  ;;  %v348_v17 = vadd.f32 %v4544_v55, %v4553_v63 }
 0x3a8   :  { %4028 = vmatpush3.bf16.msra.mxu1 %v4473_v7  ;;  %3695 = vmatprep.mubr.msk.f32.mxu1 %vm4363_vm2, %v4364_v19 }
 0x3a9   :  { %4029 = vmatprep.subr.bf16.mxu1 %v4362_v6 }
 0x3ac   :  { %4031 = vmatpush3.bf16.msra.mxu1 %v4510_v18 }
 0x3ad   :  { %4038 = vmatprep.subr.bf16.mxu1 %v4362_v6 }
 0x47a   :  { %v540_v21 = vpop.f32.mrb[8].mxu1 }
 0x47b   :  { %v544_v22 = vadd.f32 %v540_v21, %v333_v20  ;;  %v3675_v23 = vpop.f32.mrb[9].mxu1 }
 0x47d   :  { %4234 = vtanh.f32 %v544_v22  ;;  %v3353_v25 = vmul.f32 -1.442695, %v544_v22 }
 0x47f   :  { %4236 = vpow2.f32 %v3353_v25 }
 0x487   :  { %v4235_v24 = vpop.eup %4234 }
 0x488   :  { %554 = vrot.lane.b32.xlu0 %v4235_v24, %s4365_s22 }
 0x489   :  { %v4237_v26 = vpop.eup %4236 }
 0x48a   :  { %v548_v27 = vadd.f32 1.0, %v4237_v26 }
 0x48c   :  { %4238 = vrcp.f32 %v548_v27 }
 0x496   :  { %v4239_v28 = vpop.eup %4238 }
 0x497   :  { %v552_v31 = vmul.f32 %v4239_v28, %v462_v13 }
 0x4fa   :  { %v555_v29 = vpop.permute.xlu0 %554 }
 0x4fb   :  { %v557_v30 = vmul.f32 %v4239_v28, %v555_v29 }
 0x4fd   :  { %559 = vrot.lane.b32.xlu1 %v557_v30, %s4366_s5 }
 0x56f   :  { %v560_v32 = vpop.permute.xlu1 %559 }
 0x570   :  { %v562_v33 = vadd.f32 %v560_v32, %v552_v31 }
 0x572   :  { %4240 = vtanh.f32 %v562_v33 }
 0x57c   :  { %v4241_v34 = vpop.eup %4240 }
 0x57d   :  { %565 = vrot.lane.b32.xlu0 %v4241_v34, %s4365_s22 }
 0x5ef   :  { %v566_v35 = vpop.permute.xlu0 %565 }
 0x5f0   :  { %v568_v36 = vmul.f32 %v4239_v28, %v566_v35 }
 0x5f2   :  { %570 = vrot.lane.b32.xlu1 %v568_v36, %s4366_s5  ;;  %v353_v36 = vadd.f32 %v4551_v62, %v4544_v55 }
 0x664   :  { %v571_v37 = vpop.permute.xlu1 %570 }
 0x665   :  { %3685 = vmatmul.mubr.msk.f32.vlgmr.msra.gmra.mrb[10].mxu0 %vm370_vm12, %v571_v37 }
 0x666   :  { %4034 = vmatpush3.bf16.msra.mxu0 %v4473_v7  ;;  %3706 = vmatprep.mubr.msk.f32.mxu0 %vm4363_vm2, %v4364_v19 }
 0x667   :  { %4035 = vmatprep.subr.bf16.mxu0 %v4362_v6 }
 0x66a   :  { %4037 = vmatpush3.bf16.msra.mxu0 %v4510_v18 }
 0x66b   :  { %4044 = vmatprep.subr.bf16.mxu0 %v4362_v6 }
 0x738   :  { %v640_v39 = vpop.f32.mrb[10].mxu0 }
 0x739   :  { %v644_v40 = vadd.f32 %v640_v39, %v338_v38  ;;  %v3686_v41 = vpop.f32.mrb[11].mxu0 }
 0x73b   :  { %4242 = vtanh.f32 %v644_v40  ;;  %v3355_v43 = vmul.f32 -1.442695, %v644_v40 }
 0x73d   :  { %4244 = vpow2.f32 %v3355_v43 }
 0x745   :  { %v4243_v42 = vpop.eup %4242 }
 0x746   :  { %654 = vrot.lane.b32.xlu0 %v4243_v42, %s4365_s22 }
 0x747   :  { %v4245_v44 = vpop.eup %4244 }
 0x748   :  { %v648_v45 = vadd.f32 1.0, %v4245_v44 }
 0x74a   :  { %4246 = vrcp.f32 %v648_v45 }
 0x754   :  { %v4247_v46 = vpop.eup %4246 }
 0x755   :  { %v652_v49 = vmul.f32 %v4247_v46, %v562_v33 }
 0x7b8   :  { %v655_v47 = vpop.permute.xlu0 %654 }
 0x7b9   :  { %v657_v48 = vmul.f32 %v4247_v46, %v655_v47 }
 0x7bb   :  { %659 = vrot.lane.b32.xlu1 %v657_v48, %s4366_s5 }
 0x82d   :  { %v660_v50 = vpop.permute.xlu1 %659 }
 0x82e   :  { %v662_v51 = vadd.f32 %v660_v50, %v652_v49 }
 0x830   :  { %4248 = vtanh.f32 %v662_v51 }
 0x83a   :  { %v4249_v52 = vpop.eup %4248 }
 0x83b   :  { %665 = vrot.lane.b32.xlu0 %v4249_v52, %s4365_s22 }
 0x8ad   :  { %v666_v53 = vpop.permute.xlu0 %665 }
 0x8ae   :  { %v668_v54 = vmul.f32 %v4247_v46, %v666_v53 }
 0x8b0   :  { %670 = vrot.lane.b32.xlu1 %v668_v54, %s4366_s5 }
 0x922   :  { %v671_v56 = vpop.permute.xlu1 %670 }
 0x923   :  { %3696 = vmatmul.mubr.msk.f32.vlgmr.msra.gmra.mrb[10].mxu1 %vm370_vm12, %v671_v56 }
 0x924   :  { %4040 = vmatpush3.bf16.msra.mxu1 %v4473_v7  ;;  %3717 = vmatprep.mubr.msk.f32.mxu1 %vm4363_vm2, %v4364_v19 }
 0x925   :  { %4041 = vmatprep.subr.bf16.mxu1 %v4362_v6 }
 0x928   :  { %4043 = vmatpush3.bf16.msra.mxu1 %v4510_v18 }
 0x929   :  { %4050 = vmatprep.subr.bf16.mxu1 %v4362_v6 }
 0x9f6   :  { %v740_v58 = vpop.f32.mrb[10].mxu1 }
 0x9f7   :  { %v744_v59 = vadd.f32 %v740_v58, %v343_v57  ;;  %v3697_v61 = vpop.f32.mrb[11].mxu1 }
 0x9f9   :  { %4250 = vtanh.f32 %v744_v59  ;;  %v3357_v3 = vmul.f32 -1.442695, %v744_v59 }
 0x9fb   :  { %4252 = vpow2.f32 %v3357_v3 }
 0xa03   :  { %v4251_v0 = vpop.eup %4250 }
 0xa04   :  { %754 = vrot.lane.b32.xlu0 %v4251_v0, %s4365_s22 }
 0xa05   :  { %v4253_v4 = vpop.eup %4252 }
 0xa06   :  { %v748_v5 = vadd.f32 1.0, %v4253_v4 }
 0xa08   :  { %4254 = vrcp.f32 %v748_v5 }
 0xa12   :  { %v4255_v8 = vpop.eup %4254 }
 0xa13   :  { %v752_v11 = vmul.f32 %v4255_v8, %v662_v51  ;;  %v358_v51 = vadd.f32 %v4544_v55, %v4558_v2 }
 0xa76   :  { %v755_v9 = vpop.permute.xlu0 %754 }
 0xa77   :  { %v757_v10 = vmul.f32 %v4255_v8, %v755_v9 }
 0xa79   :  { %759 = vrot.lane.b32.xlu1 %v757_v10, %s4366_s5 }
 0xaeb   :  { %v760_v12 = vpop.permute.xlu1 %759 }
 0xaec   :  { %v762_v60 = vadd.f32 %v760_v12, %v752_v11  ;;  %v363_v12 = vadd.f32 %v4556_v1, %v4544_v55 }
 0xaee   :  { %4256 = vtanh.f32 %v762_v60 }
 0xaf8   :  { %v4257_v13 = vpop.eup %4256 }
 0xaf9   :  { %765 = vrot.lane.b32.xlu0 %v4257_v13, %s4365_s22 }
 0xb6b   :  { %v766_v14 = vpop.permute.xlu0 %765 }
 0xb6c   :  { %v768_v15 = vmul.f32 %v4255_v8, %v766_v14 }
 0xb6e   :  { %770 = vrot.lane.b32.xlu1 %v768_v15, %s4366_s5 }
 0xbe0   :  { %v771_v16 = vpop.permute.xlu1 %770 }
 0xbe1   :  { %3707 = vmatmul.mubr.msk.f32.vlgmr.msra.gmra.mrb[12].mxu0 %vm370_vm12, %v771_v16 }
 0xbe2   :  { %4046 = vmatpush3.bf16.msra.mxu0 %v4473_v7  ;;  %3728 = vmatprep.mubr.msk.f32.mxu0 %vm4363_vm2, %v4364_v19 }
 0xbe3   :  { %4047 = vmatprep.subr.bf16.mxu0 %v4362_v6 }
 0xbe6   :  { %4049 = vmatpush3.bf16.msra.mxu0 %v4510_v18 }
 0xbe7   :  { %4056 = vmatprep.subr.bf16.mxu0 %v4362_v6 }
 0xcb4   :  { %v840_v20 = vpop.f32.mrb[12].mxu0 }
 0xcb5   :  { %v844_v21 = vadd.f32 %v840_v20, %v348_v17  ;;  %v3708_v22 = vpop.f32.mrb[13].mxu0 }
 0xcb7   :  { %4258 = vtanh.f32 %v844_v21  ;;  %v3359_v24 = vmul.f32 -1.442695, %v844_v21 }
 0xcb9   :  { %4260 = vpow2.f32 %v3359_v24 }
 0xcc1   :  { %v4259_v23 = vpop.eup %4258 }
 0xcc2   :  { %854 = vrot.lane.b32.xlu0 %v4259_v23, %s4365_s22 }
 0xcc3   :  { %v4261_v25 = vpop.eup %4260 }
 0xcc4   :  { %v848_v26 = vadd.f32 1.0, %v4261_v25 }
 0xcc6   :  { %4262 = vrcp.f32 %v848_v26  ;;  %v1169_v26 = vld [vmem:[%s5059_s6] sm:$0xff] }
 0xcd0   :  { %v4263_v27 = vpop.eup %4262 }
 0xcd1   :  { %v852_v30 = vmul.f32 %v4263_v27, %v762_v60 }
 0xd34   :  { %v855_v28 = vpop.permute.xlu0 %854 }
 0xd35   :  { %v857_v29 = vmul.f32 %v4263_v27, %v855_v28  ;;  %v1259_v28 = vld [vmem:[%s5060_s8] sm:$0xff] }
 0xd37   :  { %859 = vrot.lane.b32.xlu1 %v857_v29, %s4366_s5 }
 0xda9   :  { %v860_v31 = vpop.permute.xlu1 %859 }
 0xdaa   :  { %v862_v63 = vadd.f32 %v860_v31, %v852_v30  ;;  %v1260_v30 = vld [vmem:[%s5060_s8 + $0x8] sm:$0xff]  ;;  %v1171_v31 = vld [vmem:[%s5059_s6 + $0x10] sm:$0xff] }
 0xdac   :  { %4264 = vtanh.f32 %v862_v63 }
 0xdb6   :  { %v4265_v32 = vpop.eup %4264 }
 0xdb7   :  { %865 = vrot.lane.b32.xlu0 %v4265_v32, %s4365_s22  ;;  %v4063_v32 = vpack.c.bf16 %v1260_v30, %v1259_v28  ;;  %v3412_v30 = vld [vmem:[%s5060_s8 + $0x138] sm:$0xff] }
 0xe29   :  { %v866_v33 = vpop.permute.xlu0 %865 }
 0xe2a   :  { %v868_v34 = vmul.f32 %v4263_v27, %v866_v33  ;;  %v1170_v27 = vld [vmem:[%s5059_s6 + $0x8] sm:$0xff]  ;;  %v1261_v33 = vld [vmem:[%s5060_s8 + $0x10] sm:$0xff] }
 0xe2b   :  { %v4057_v29 = vpack.c.bf16 %v1170_v27, %v1169_v26  ;;  %v3384_v26 = vld [vmem:[%s5060_s8 + $0x80] sm:$0xff]  ;;  %v3385_v27 = vld [vmem:[%s5060_s8 + $0x88] sm:$0xff] }
 0xe2c   :  { %870 = vrot.lane.b32.xlu1 %v868_v34, %s4366_s5  ;;  %v1262_v34 = vld [vmem:[%s5060_s8 + $0x18] sm:$0xff] }
 0xe9e   :  { %v871_v35 = vpop.permute.xlu1 %870 }
 0xe9f   :  { %3718 = vmatmul.mubr.msk.f32.vlgmr.msra.gmra.mrb[12].mxu1 %vm370_vm12, %v871_v35 }
 0xea0   :  { %4052 = vmatpush3.bf16.msra.mxu1 %v4473_v7  ;;  %3739 = vmatprep.mubr.msk.f32.mxu1 %vm4363_vm2, %v4364_v19 }
 0xea1   :  { %4053 = vmatprep.subr.bf16.mxu1 %v4362_v6 }
 0xea4   :  { %4055 = vmatpush3.bf16.msra.mxu1 %v4510_v18 }
 0xea5   :  { %4062 = vmatprep.subr.bf16.mxu1 %v4362_v6 }
 0xf72   :  { %v940_v37 = vpop.f32.mrb[12].mxu1 }
 0xf73   :  { %v944_v38 = vadd.f32 %v940_v37, %v353_v36  ;;  %v3719_v39 = vpop.f32.mrb[13].mxu1  ;;  %v4066_v36 = vpack.c.bf16 %v1262_v34, %v1261_v33 }
 0xf75   :  { %4266 = vtanh.f32 %v944_v38  ;;  %v3361_v7 = vmul.f32 -1.442695, %v944_v38 }
 0xf77   :  { %4268 = vpow2.f32 %v3361_v7 }
 0xf7f   :  { %v4267_v40 = vpop.eup %4266 }
 0xf80   :  { %954 = vrot.lane.b32.xlu0 %v4267_v40, %s4365_s22 }
 0xf81   :  { %v4269_v41 = vpop.eup %4268 }
 0xf82   :  { %v948_v42 = vadd.f32 1.0, %v4269_v41 }
 0xf84   :  { %4270 = vrcp.f32 %v948_v42 }
 0xf8e   :  { %v4271_v43 = vpop.eup %4270 }
 0xf8f   :  { %v952_v45 = vmul.f32 %v4271_v43, %v862_v63  ;;  %v1172_v63 = vld [vmem:[%s5059_s6 + $0x18] sm:$0xff] }
 0xf90   :  { %v4060_v35 = vpack.c.bf16 %v1172_v63, %v1171_v31  ;;  %v4087_v31 = vpack.c.bf16 %v3385_v27, %v3384_v26  ;;  %v3386_v63 = vld [vmem:[%s5060_s8 + $0x90] sm:$0xff] }
 0xff2   :  { %v955_v44 = vpop.permute.xlu0 %954 }
 0xff3   :  { %v957_v18 = vmul.f32 %v4271_v43, %v955_v44  ;;  %v3394_v44 = vld [vmem:[%s5060_s8 + $0xc0] sm:$0xff] }
 0xff5   :  { %959 = vrot.lane.b32.xlu1 %v957_v18, %s4366_s5  ;;  %v3395_v18 = vld [vmem:[%s5060_s8 + $0xc8] sm:$0xff] }
0x1067   :  { %v960_v46 = vpop.permute.xlu1 %959 }
0x1068   :  { %v962_v62 = vadd.f32 %v960_v46, %v952_v45  ;;  %v3369_v45 = vld [vmem:[%s5060_s8 + $0x20] sm:$0xff]  ;;  %v3370_v46 = vld [vmem:[%s5060_s8 + $0x28] sm:$0xff] }
0x106a   :  { %4272 = vtanh.f32 %v962_v62 }
0x1074   :  { %v4273_v47 = vpop.eup %4272 }
0x1075   :  { %965 = vrot.lane.b32.xlu0 %v4273_v47, %s4365_s22  ;;  %v3396_v47 = vld [vmem:[%s5060_s8 + $0xd0] sm:$0xff] }
0x10e7   :  { %v966_v48 = vpop.permute.xlu0 %965 }
0x10e8   :  { %v968_v49 = vmul.f32 %v4271_v43, %v966_v48  ;;  %v3397_v48 = vld [vmem:[%s5060_s8 + $0xd8] sm:$0xff] }
0x10ea   :  { %970 = vrot.lane.b32.xlu1 %v968_v49, %s4366_s5 }
0x115c   :  { %v971_v50 = vpop.permute.xlu1 %970 }
0x115d   :  { %3729 = vmatmul.mubr.msk.f32.vlgmr.msra.gmra.mrb[14].mxu0 %vm370_vm12, %v971_v50  ;;  %v4069_v50 = vpack.c.bf16 %v3370_v46, %v3369_v45  ;;  %v3419_v46 = vld [vmem:[%s5060_s8 + $0x160] sm:$0xff] }
0x115e   :  { %3750 = vmatprep.mubr.msk.f32.mxu0 %vm4363_vm2, %v4364_v19  ;;  %4058 = vmatpush3.bf16.msra.mxu0 %v4057_v29  ;;  %v3411_v29 = vld [vmem:[%s5060_s8 + $0x130] sm:$0xff] }
0x115f   :  { %4059 = vmatprep.subr.bf16.mxu0 %v4362_v6  ;;  %v4120_v34 = vpack.c.bf16 %v3412_v30, %v3411_v29 }
0x1162   :  { %4061 = vmatpush3.bf16.msra.mxu0 %v4060_v35  ;;  %v3414_v35 = vld [vmem:[%s5060_s8 + $0x140] sm:$0xff] }
0x1163   :  { %4098 = vmatprep.subr.bf16.mxu0 %v4362_v6 }
0x1230   :  { %v1040_v52 = vpop.f32.mrb[14].mxu0 }
0x1231   :  { %v1044_v53 = vadd.f32 %v1040_v52, %v358_v51  ;;  %v3730_v54 = vpop.f32.mrb[15].mxu0  ;;  %v3371_v51 = vld [vmem:[%s5060_s8 + $0x30] sm:$0xff]  ;;  %v3372_v52 = vld [vmem:[%s5060_s8 + $0x38] sm:$0xff] }
0x1232   :  { %v4102_v54 = vpack.c.bf16 %v3397_v48, %v3396_v47 }
0x1233   :  { %4274 = vtanh.f32 %v1044_v53  ;;  %v3363_v57 = vmul.f32 -1.442695, %v1044_v53 }
0x1235   :  { %4276 = vpow2.f32 %v3363_v57  ;;  %v3400_v57 = vld [vmem:[%s5060_s8 + $0xe8] sm:$0xff] }
0x123d   :  { %v4275_v56 = vpop.eup %4274 }
0x123e   :  { %1054 = vrot.lane.b32.xlu0 %v4275_v56, %s4365_s22  ;;  %v3399_v56 = vld [vmem:[%s5060_s8 + $0xe0] sm:$0xff] }
0x123f   :  { %v4277_v58 = vpop.eup %4276 }
0x1240   :  { %v1048_v59 = vadd.f32 1.0, %v4277_v58  ;;  %v4072_v58 = vpack.c.bf16 %v3372_v52, %v3371_v51 }
0x1242   :  { %4278 = vrcp.f32 %v1048_v59  ;;  %v3374_v59 = vld [vmem:[%s5060_s8 + $0x40] sm:$0xff] }
0x124c   :  { %v4279_v61 = vpop.eup %4278 }
0x124d   :  { %v1052_v4 = vmul.f32 %v4279_v61, %v962_v62  ;;  %v4099_v62 = vpack.c.bf16 %v3395_v18, %v3394_v44  ;;  %v3392_v44 = vld [vmem:[%s5060_s8 + $0xb8] sm:$0xff] }
0x12b0   :  { %v1055_v0 = vpop.permute.xlu0 %1054 }
0x12b1   :  { %v1057_v3 = vmul.f32 %v4279_v61, %v1055_v0  ;;  %v4105_v0 = vpack.c.bf16 %v3400_v57, %v3399_v56  ;;  %v2370_v57 = vld [vmem:[%s5062_s13] sm:$0xff] }
0x12b3   :  { %1059 = vrot.lane.b32.xlu1 %v1057_v3, %s4366_s5  ;;  %v3401_v3 = vld [vmem:[%s5060_s8 + $0xf0] sm:$0xff] }
0x1325   :  { %v1060_v5 = vpop.permute.xlu1 %1059 }
0x1326   :  { %v1062_v2 = vadd.f32 %v1060_v5, %v1052_v4  ;;  %v3402_v4 = vld [vmem:[%s5060_s8 + $0xf8] sm:$0xff] }
0x1328   :  { %4280 = vtanh.f32 %v1062_v2 }
0x1332   :  { %v4281_v8 = vpop.eup %4280 }
0x1333   :  { %1065 = vrot.lane.b32.xlu0 %v4281_v8, %s4365_s22  ;;  %v3377_v8 = vld [vmem:[%s5060_s8 + $0x58] sm:$0xff] }
0x13a5   :  { %v1066_v9 = vpop.permute.xlu0 %1065 }
0x13a6   :  { %v1068_v10 = vmul.f32 %v4279_v61, %v1066_v9  ;;  %v3375_v61 = vld [vmem:[%s5060_s8 + $0x48] sm:$0xff] }
0x13a7   :  { %v4075_v5 = vpack.c.bf16 %v3375_v61, %v3374_v59  ;;  %v2372_v61 = vld [vmem:[%s5062_s13 + $0x10] sm:$0xff] }
0x13a8   :  { %1070 = vrot.lane.b32.xlu1 %v1068_v10, %s4366_s5  ;;  %v4108_v10 = vpack.c.bf16 %v3402_v4, %v3401_v3  ;;  %v3366_v4 = vld [vmem:[%s5063_s7] ss:$0 sm:$0xff] }
0x141a   :  { %v1071_v11 = vpop.permute.xlu1 %1070 }
0x141b   :  { %3740 = vmatmul.mubr.msk.f32.vlgmr.msra.gmra.mrb[14].mxu1 %vm370_vm12, %v1071_v11  ;;  %v3404_v11 = vld [vmem:[%s5060_s8 + $0x100] sm:$0xff] }
0x141c   :  { %3761 = vmatprep.mubr.msk.f32.mxu1 %vm4363_vm2, %v4364_v19  ;;  %4064 = vmatpush3.bf16.msra.mxu1 %v4063_v32  ;;  %v3387_v32 = vld [vmem:[%s5060_s8 + $0x98] sm:$0xff] }
0x141d   :  { %4065 = vmatprep.subr.bf16.mxu1 %v4362_v6 }
0x1420   :  { %4067 = vmatpush3.bf16.msra.mxu1 %v4066_v36  ;;  %v3415_v36 = vld [vmem:[%s5060_s8 + $0x148] sm:$0xff] }
0x1421   :  { %4068 = vmatprep.subr.bf16.mxu1 %v4362_v6 }
0x14ee   :  { %v1140_v60 = vpop.f32.mrb[14].mxu1 }
0x14ef   :  { %v1144_v13 = vadd.f32 %v1140_v60, %v363_v12  ;;  %v3741_v14 = vpop.f32.mrb[15].mxu1  ;;  %v3405_v12 = vld [vmem:[%s5060_s8 + $0x108] sm:$0xff] }
0x14f0   :  { %v3380_v14 = vld [vmem:[%s5060_s8 + $0x68] sm:$0xff] }
0x14f1   :  { %4282 = vtanh.f32 %v1144_v13  ;;  %v3365_v16 = vmul.f32 -1.442695, %v1144_v13  ;;  %v3379_v13 = vld [vmem:[%s5060_s8 + $0x60] sm:$0xff] }
0x14f3   :  { %4284 = vpow2.f32 %v3365_v16  ;;  %v3406_v16 = vld [vmem:[%s5060_s8 + $0x110] sm:$0xff] }
0x14fb   :  { %v4283_v15 = vpop.eup %4282 }
0x14fc   :  { %1154 = vrot.lane.b32.xlu0 %v4283_v15, %s4365_s22  ;;  %v4111_v15 = vpack.c.bf16 %v3405_v12, %v3404_v11 }
0x14fd   :  { %v4285_v17 = vpop.eup %4284 }
0x14fe   :  { %v1148_v20 = vadd.f32 1.0, %v4285_v17  ;;  %v3407_v17 = vld [vmem:[%s5060_s8 + $0x118] sm:$0xff] }
0x1500   :  { %4286 = vrcp.f32 %v1148_v20  ;;  %v4081_v20 = vpack.c.bf16 %v3380_v14, %v3379_v13  ;;  %v2211_v13 = vld [vmem:[%s5064_s10 + $0x18] sm:$0xff] }
0x150a   :  { %v4287_v21 = vpop.eup %4286 }
0x150b   :  { %v1152_v24 = vmul.f32 %v4287_v21, %v1062_v2  ;;  %v3376_v2 = vld [vmem:[%s5060_s8 + $0x50] sm:$0xff] }
0x150c   :  { %v4078_v60 = vpack.c.bf16 %v3377_v8, %v3376_v2  ;;  %v2208_v2 = vld [vmem:[%s5064_s10] sm:$0xff]  ;;  %v2209_v8 = vld [vmem:[%s5064_s10 + $0x8] sm:$0xff] }
0x150d   :  { %v4138_v12 = vpack.c.bf16 %v2209_v8, %v2208_v2 }
0x156e   :  { %v1155_v22 = vpop.permute.xlu0 %1154 }
0x156f   :  { %v1157_v23 = vmul.f32 %v4287_v21, %v1155_v22  ;;  %v3382_v22 = vld [vmem:[%s5060_s8 + $0x78] sm:$0xff] }
0x1571   :  { %1159 = vrot.lane.b32.xlu1 %v1157_v23, %s4366_s5 }
0x15e3   :  { %v1160_v25 = vpop.permute.xlu1 %1159 }
0x15e4   :  { %v1162_v55 = vadd.f32 %v1160_v25, %v1152_v24  ;;  %v4114_v24 = vpack.c.bf16 %v3407_v17, %v3406_v16  ;;  %v3409_v25 = vld [vmem:[%s5060_s8 + $0x120] sm:$0xff] }
0x15e5   :  { %v2212_v16 = vld [vmem:[%s5064_s10 + $0x20] sm:$0xff] }
0x15e6   :  { %4288 = vtanh.f32 %v1162_v55  ;;  %v3410_v55 = vld [vmem:[%s5060_s8 + $0x128] sm:$0xff]  ;;  %v1258_v17 = vld [vmem:[%s5065_s9] sm:$0x1] }
0x15e7   :  { %v4117_v28 = vpack.c.bf16 %v3410_v55, %v3409_v25 }
0x15f0   :  { %v4289_v1 = vpop.eup %4288 }
0x15f1   :  { %1165 = vrot.lane.b32.xlu0 %v4289_v1, %s4365_s22 }
0x1663   :  { %v1166_v37 = vpop.permute.xlu0 %1165 }
0x1664   :  { %v1168_v38 = vmul.f32 %v4287_v21, %v1166_v37  ;;  %v3381_v21 = vld [vmem:[%s5060_s8 + $0x70] sm:$0xff]  ;;  %v4090_v37 = vpack.c.bf16 %v3387_v32, %v3386_v63  ;;  %v3426_v32 = vld [vmem:[%s5066_s12] ss:$0 sm:$0xff] }
0x1665   :  { %v4084_v1 = vpack.c.bf16 %v3382_v22, %v3381_v21 }
0x1666   :  { %1181 = vrot.lane.b32.xlu1 %v1168_v38, %s4366_s5  ;;  %v1263_v39 = vrot.slane %v1168_v38, 2  ;;  %v1344_v40 = vrot.slane %v1168_v38, 3  ;;  %v1425_v7 = vrot.slane %v1168_v38, 4  ;;  %v1506_v41 = vrot.slane %v1168_v38, 5 }
0x1667   :  { %v1587_v42 = vrot.slane %v1168_v38, 6  ;;  %v1668_v43 = vrot.slane %v1168_v38, 7  ;;  %v3389_v38 = vld [vmem:[%s5060_s8 + $0xa0] sm:$0xff] }
0x1668   :  { %1264 = vrot.lane.b32.xlu0 %v1263_v39, %s4366_s5  ;;  %v3390_v39 = vld [vmem:[%s5060_s8 + $0xa8] sm:$0xff] }
0x166a   :  { %1345 = vrot.lane.b32.xlu1 %v1344_v40, %s4366_s5  ;;  %v4123_v40 = vpack.c.bf16 %v3415_v36, %v3414_v35 }
0x166c   :  { %1426 = vrot.lane.b32.xlu0 %v1425_v7, %s4366_s5  ;;  %v3416_v7 = vld [vmem:[%s5060_s8 + $0x150] sm:$0xff] }
0x166e   :  { %1507 = vrot.lane.b32.xlu1 %v1506_v41, %s4366_s5  ;;  %v3417_v41 = vld [vmem:[%s5060_s8 + $0x158] sm:$0xff] }
0x166f   :  { %v4126_v45 = vpack.c.bf16 %v3417_v41, %v3416_v7 }
0x1670   :  { %1588 = vrot.lane.b32.xlu0 %v1587_v42, %s4366_s5  ;;  %v4093_v42 = vpack.c.bf16 %v3390_v39, %v3389_v38 }
0x1672   :  { %1669 = vrot.lane.b32.xlu1 %v1668_v43, %s4366_s5  ;;  %v3391_v43 = vld [vmem:[%s5060_s8 + $0xb0] sm:$0xff] }
0x1673   :  { %v4096_v47 = vpack.c.bf16 %v3392_v44, %v3391_v43 }
0x16d8   :  { %v1182_v49 = vpop.permute.xlu1 %1181 }
0x16d9   :  { %3751 = vmatmul.mubr.msk.f32.vlgmr.msra.gmra.mrb[16].mxu0 %vm370_vm12, %v1182_v49  ;;  %v3421_v49 = vld [vmem:[%s5060_s8 + $0x170] sm:$0xff] }
0x16da   :  { %4100 = vmatpush3.bf16.msra.mxu0 %v4099_v62  ;;  %v1265_v53 = vpop.permute.xlu0 %1264  ;;  %3827 = vmatprep.mubr.msk.f32.mxu0 %vm4363_vm2, %v4364_v19  ;;  %v3420_v62 = vld [vmem:[%s5060_s8 + $0x168] sm:$0xff] }
0x16db   :  { %3762 = vmatmul.mubr.msk.f32.vlgmr.msra.gmra.mrb[16].mxu1 %vm370_vm12, %v1265_v53  ;;  %4101 = vmatprep.subr.bf16.mxu0 %v4362_v6  ;;  %v4129_v48 = vpack.c.bf16 %v3420_v62, %v3419_v46 }
0x16dc   :  { %4070 = vmatpush3.bf16.msra.mxu1 %v4069_v50  ;;  %3772 = vmatprep.mubr.msk.f32.mxu1 %vm4363_vm2, %v4364_v19  ;;  %v1346_v9 = vpop.permute.xlu1 %1345  ;;  %v3422_v50 = vld [vmem:[%s5060_s8 + $0x178] sm:$0xff] }
0x16dd   :  { %4071 = vmatprep.subr.bf16.mxu1 %v4362_v6  ;;  %v4132_v52 = vpack.c.bf16 %v3422_v50, %v3421_v49 }
0x16de   :  { %4103 = vmatpush3.bf16.msra.mxu0 %v4102_v54  ;;  %v1427_v23 = vpop.permute.xlu0 %1426  ;;  %v2214_v54 = vld [vmem:[%s5061_s11 + $0x8] sm:$0xff] }
0x16df   :  { %4104 = vmatprep.subr.bf16.mxu0 %v4362_v6 }
0x16e0   :  { %4073 = vmatpush3.bf16.msra.mxu1 %v4072_v58  ;;  %v1508_v33 = vpop.permute.xlu1 %1507  ;;  %v2371_v58 = vld [vmem:[%s5062_s13 + $0x8] sm:$0xff] }
0x16e1   :  { %3828 = vmatmul.mubr.msk.f32.vlgmr.msra.gmra.mrb[18].mxu0 %vm370_vm12, %v1265_v53  ;;  %4074 = vmatprep.subr.bf16.mxu1 %v4362_v6  ;;  %v2213_v53 = vld [vmem:[%s5061_s11] sm:$0xff]  ;;  %v4885_v59 = vpack.c.bf16 %v2371_v58, %v2370_v57 }
0x16e2   :  { %4106 = vmatpush3.bf16.msra.mxu0 %v4105_v0  ;;  %3838 = vmatprep.mubr.msk.f32.mxu0 %vm4363_vm2, %v4364_v19  ;;  %v1589_v18 = vpop.permute.xlu0 %1588  ;;  %v4135_v56 = vpack.c.bf16 %v2214_v54, %v2213_v53  ;;  %v2373_v0 = vld [vmem:[%s5062_s13 + $0x18] sm:$0xff] }
0x16e3   :  { %3773 = vmatmul.mubr.msk.f32.vlgmr.msra.gmra.mrb[16].mxu1 %vm370_vm12, %v1346_v9  ;;  %4107 = vmatprep.subr.bf16.mxu0 %v4362_v6  ;;  %v4895_v3 = vpack.c.bf16 %v2373_v0, %v2372_v61 }
0x16e4   :  { %4076 = vmatpush3.bf16.msra.mxu1 %v4075_v5  ;;  %3783 = vmatprep.mubr.msk.f32.mxu1 %vm4363_vm2, %v4364_v19  ;;  %v1670_v51 = vpop.permute.xlu1 %1669 }
0x16e5   :  { %4077 = vmatprep.subr.bf16.mxu1 %v4362_v6 }
0x16e6   :  { %4109 = vmatpush3.bf16.msra.mxu0 %v4108_v10 }
0x16e7   :  { %4110 = vmatprep.subr.bf16.mxu0 %v4362_v6 }
0x16e8   :  { %4079 = vmatpush3.bf16.msra.mxu1 %v4078_v60  ;;  %v2210_v60 = vld [vmem:[%s5064_s10 + $0x10] sm:$0xff] }
0x16e9   :  { %3839 = vmatmul.mubr.msk.f32.vlgmr.msra.gmra.mrb[18].mxu0 %vm370_vm12, %v1346_v9  ;;  %4080 = vmatprep.subr.bf16.mxu1 %v4362_v6 }
0x16ea   :  { %4112 = vmatpush3.bf16.msra.mxu0 %v4111_v15  ;;  %3849 = vmatprep.mubr.msk.f32.mxu0 %vm4363_vm2, %v4364_v19  ;;  %v4141_v15 = vpack.c.bf16 %v2211_v13, %v2210_v60 }
0x16eb   :  { %3784 = vmatmul.mubr.msk.f32.vlgmr.msra.gmra.mrb[16].mxu1 %vm370_vm12, %v1427_v23  ;;  %4113 = vmatprep.subr.bf16.mxu0 %v4362_v6 }
0x16ec   :  { %4082 = vmatpush3.bf16.msra.mxu1 %v4081_v20  ;;  %3794 = vmatprep.mubr.msk.f32.mxu1 %vm4363_vm2, %v4364_v19 }
0x16ed   :  { %4083 = vmatprep.subr.bf16.mxu1 %v4362_v6 }
0x16ee   :  { %4115 = vmatpush3.bf16.msra.mxu0 %v4114_v24 }
0x16ef   :  { %4116 = vmatprep.subr.bf16.mxu0 %v4362_v6 }
0x16f0   :  { %4085 = vmatpush3.bf16.msra.mxu1 %v4084_v1 }
0x16f1   :  { %3850 = vmatmul.mubr.msk.f32.vlgmr.msra.gmra.mrb[18].mxu0 %vm370_vm12, %v1427_v23  ;;  %4086 = vmatprep.subr.bf16.mxu1 %v4362_v6  ;;  %v1746_v23 = vld [vmem:[%s5065_s9] sm:$0x1] }
0x16f2   :  { %4118 = vmatpush3.bf16.msra.mxu0 %v4117_v28  ;;  %3860 = vmatprep.mubr.msk.f32.mxu0 %vm4363_vm2, %v4364_v19 }
0x16f3   :  { %3795 = vmatmul.mubr.msk.f32.vlgmr.msra.gmra.mrb[16].mxu1 %vm370_vm12, %v1508_v33  ;;  %4119 = vmatprep.subr.bf16.mxu0 %v4362_v6 }
0x16f4   :  { %4088 = vmatpush3.bf16.msra.mxu1 %v4087_v31  ;;  %3805 = vmatprep.mubr.msk.f32.mxu1 %vm4363_vm2, %v4364_v19 }
0x16f5   :  { %4089 = vmatprep.subr.bf16.mxu1 %v4362_v6 }
0x16f6   :  { %4121 = vmatpush3.bf16.msra.mxu0 %v4120_v34 }
0x16f7   :  { %4122 = vmatprep.subr.bf16.mxu0 %v4362_v6 }
0x16f8   :  { %4091 = vmatpush3.bf16.msra.mxu1 %v4090_v37 }
0x16f9   :  { %3861 = vmatmul.mubr.msk.f32.vlgmr.msra.gmra.mrb[18].mxu0 %vm370_vm12, %v1508_v33  ;;  %4092 = vmatprep.subr.bf16.mxu1 %v4362_v6 }
0x16fa   :  { %4124 = vmatpush3.bf16.msra.mxu0 %v4123_v40  ;;  %3871 = vmatprep.mubr.msk.f32.mxu0 %vm4363_vm2, %v4364_v19 }
0x16fb   :  { %3806 = vmatmul.mubr.msk.f32.vlgmr.msra.gmra.mrb[16].mxu1 %vm370_vm12, %v1589_v18  ;;  %4125 = vmatprep.subr.bf16.mxu0 %v4362_v6 }
0x16fc   :  { %4094 = vmatpush3.bf16.msra.mxu1 %v4093_v42  ;;  %3816 = vmatprep.mubr.msk.f32.mxu1 %vm4363_vm2, %v4364_v19 }
0x16fd   :  { %4095 = vmatprep.subr.bf16.mxu1 %v4362_v6 }
0x16fe   :  { %4127 = vmatpush3.bf16.msra.mxu0 %v4126_v45 }
0x16ff   :  { %4128 = vmatprep.subr.bf16.mxu0 %v4362_v6 }
0x1700   :  { %4097 = vmatpush3.bf16.msra.mxu1 %v4096_v47 }
0x1701   :  { %3872 = vmatmul.mubr.msk.f32.vlgmr.msra.gmra.mrb[18].mxu0 %vm370_vm12, %v1589_v18  ;;  %4134 = vmatprep.subr.bf16.mxu1 %v4362_v6 }
0x1702   :  { %4130 = vmatpush3.bf16.msra.mxu0 %v4129_v48  ;;  %3882 = vmatprep.mubr.msk.f32.mxu0 %vm4363_vm2, %v4364_v19 }
0x1703   :  { %3817 = vmatmul.mubr.msk.f32.vlgmr.msra.gmra.mrb[16].mxu1 %vm370_vm12, %v1670_v51  ;;  %4131 = vmatprep.subr.bf16.mxu0 %v4362_v6 }
0x1704   :  { %3889 = vmatprep.mubr.msk.f32.mxu1 %vm4363_vm2, %v4364_v19  ;;  %4136 = vmatpush3.bf16.msra.mxu1 %v4135_v56 }
0x1705   :  { %4137 = vmatprep.subr.bf16.mxu1 %v4362_v6 }
0x1706   :  { %4133 = vmatpush3.bf16.msra.mxu0 %v4132_v52 }
0x1707   :  { %4143 = vmatprep.subr.bf16.mxu0 %v4362_v6 }
0x1709   :  { %3883 = vmatmul.mubr.msk.f32.vlgmr.msra.gmra.mrb[18].mxu0 %vm370_vm12, %v1670_v51 }
0x170a   :  { %3913 = vmatprep.mubr.msk.f32.mxu0 %vm4363_vm2, %v4364_v19  ;;  %4145 = vmatpush3.bf16.msra.mxu0 %v4885_v59 }
0x170b   :  { %4146 = vmatprep.subr.bf16.mxu0 %v4362_v6 }
0x170e   :  { %4148 = vmatpush3.bf16.msra.mxu0 %v4895_v3 }
0x170f   :  { %4149 = vmatprep.subr.bf16.mxu0 %v4362_v6 }
0x1711   :  { %3914 = vmatmul.mubr.f32.vlgmr.msra.gmra.mrb[20].mxu0 %v4364_v19 }
0x1712   :  { %4151 = vmatpush3.bf16.msra.mxu0 %v4885_v59  ;;  %3924 = vmatprep.mubr.msk.f32.mxu0 %vm4363_vm2, %v4364_v19 }
0x1713   :  { %4152 = vmatprep.subr.bf16.mxu0 %v4362_v6 }
0x1716   :  { %4154 = vmatpush3.bf16.msra.mxu0 %v4895_v3 }
0x1717   :  { %4161 = vmatprep.subr.bf16.mxu0 %v4362_v6 }
0x17ac   :  { %v1251_v5 = vpop.f32.mrb[16].mxu0 }
0x17ad   :  { %v1252_v9 = vadd.f32 %v3366_v4, %v1251_v5  ;;  %v3752_v10 = vpop.f32.mrb[17].mxu0 }
0x17af   :  { %vm1255_vm13 = vcmp.ge.f32.partialorder %v1252_v9, 0.0  ;;  %v1256_v11 = vmul.f32 0.1, %v1252_v9 }
0x17b1   :  { %v1257_v14 = vsel %vm1255_vm13, %v1252_v9, %v1256_v11 }
0x17b2   :  { %3890 = vmatmul.mubr.msk.f32.vlgmr.msra.gmra.mrb[18].mxu1 %vm236_vm5, %v1257_v14 }
0x17b3   :  { %4139 = vmatpush3.bf16.msra.mxu1 %v4138_v12  ;;  %3902 = vmatprep.mubr.msk.f32.mxu1 %vm4363_vm2, %v4364_v19 }
0x17b4   :  { %4140 = vmatprep.subr.bf16.mxu1 %v4362_v6 }
0x17b7   :  { %4142 = vmatpush3.bf16.msra.mxu1 %v4141_v15 }
0x17b8   :  { %3900 = vmatprep.subr.mxu1 %v4364_v19 }
0x17bb   :  { %3901 = vmatpush3.msra.mxu1 %v2212_v16 }
0x17bc   :  { %4155 = vmatprep.subr.bf16.mxu1 %v4362_v6 }
0x17d6   :  { %v1739_v20 = vpop.f32.mrb[16].mxu1 }
0x17d7   :  { %v4199_v21 = vadd.f32 %v1739_v20, %v1258_v17  ;;  %v3818_v22 = vpop.f32.mrb[17].mxu1 }
0x17d9   :  { %1745 = vst.msk [vmem:[#allocation2] sm:$0x1] %vm1744_vm14, %v4199_v21 }
0x17dc   :  { %v2198_v24 = vpop.f32.mrb[18].mxu0 }
0x17dd   :  { %v4200_v25 = vadd.f32 %v2198_v24, %v1746_v23  ;;  %v3884_v55 = vpop.f32.mrb[19].mxu0 }
0x17df   :  { %2203 = vst.msk [vmem:[#allocation2 + $0x1] sm:$0x1] %vm1744_vm14, %v4200_v25 }
0x17e4   :  { %v2440_v28 = vpop.f32.mrb[20].mxu0 }
0x17e5   :  { %v3915_v29 = vpop.f32.mrb[21].mxu0 }
0x17e6   :  { %v2204_v1 = vld [vmem:[#allocation2] sm:$0x3] }
0x17e7   :  { %vm2205_vm15 = vcmp.ge.f32.partialorder %v2204_v1, 0.0  ;;  %v2206_v26 = vmul.f32 0.1, %v2204_v1 }
0x17e9   :  { %v2207_v27 = vsel %vm2205_vm15, %v2204_v1, %v2206_v26 }
0x17ea   :  { %3903 = vmatmul.mubr.msk.f32.vlgmr.msra.gmra.mrb[20].mxu1 %vm2288_vm0, %v2207_v27 }
0x17eb   :  { %4157 = vmatpush3.bf16.msra.mxu1 %v4885_v59  ;;  %3935 = vmatprep.mubr.msk.f32.mxu1 %vm4363_vm2, %v4364_v19 }
0x17ec   :  { %4158 = vmatprep.subr.bf16.mxu1 %v4362_v6 }
0x17ef   :  { %4160 = vmatpush3.bf16.msra.mxu1 %v4895_v3 }
0x17f0   :  { %4167 = vmatprep.subr.bf16.mxu1 %v4362_v6 }
0x1885   :  { %v2284_v30 = vpop.f32.mrb[18].mxu1 }
0x1886   :  { %v3891_v31 = vpop.f32.mrb[19].mxu1 }
0x18bd   :  { %v2358_v63 = vpop.f32.mrb[20].mxu1 }
0x18be   :  { %v2359_v33 = vadd.f32 %v2358_v63, %v2284_v30  ;;  %v3904_v34 = vpop.f32.mrb[21].mxu1 }
0x18c0   :  { %v4945_v35 = vadd.f32 %v3426_v32, %v2359_v33 }
0x18c2   :  { %v2444_v36 = vadd.f32 %v2440_v28, %v4945_v35 }
0x18c4   :  { %4290 = vtanh.f32 %v2444_v36  ;;  %v3427_v38 = vmul.f32 -1.442695, %v2444_v36 }
0x18c6   :  { %4292 = vpow2.f32 %v3427_v38 }
0x18ce   :  { %v4291_v37 = vpop.eup %4290 }
0x18cf   :  { %2454 = vrot.lane.b32.xlu0 %v4291_v37, %s4365_s22 }
0x18d0   :  { %v4293_v39 = vpop.eup %4292 }
0x18d1   :  { %v2448_v40 = vadd.f32 1.0, %v4293_v39 }
0x18d3   :  { %4294 = vrcp.f32 %v2448_v40 }
0x18dd   :  { %v4295_v7 = vpop.eup %4294 }
0x18de   :  { %v2452_v43 = vmul.f32 0.0, %v4295_v7 }
0x1941   :  { %v2455_v41 = vpop.permute.xlu0 %2454 }
0x1942   :  { %v2457_v42 = vmul.f32 %v4295_v7, %v2455_v41 }
0x1944   :  { %2459 = vrot.lane.b32.xlu1 %v2457_v42, %s4366_s5 }
0x19b6   :  { %v2460_v44 = vpop.permute.xlu1 %2459 }
0x19b7   :  { %v2462_v18 = vadd.f32 %v2460_v44, %v2452_v43 }
0x19b9   :  { %4296 = vtanh.f32 %v2462_v18 }
0x19c3   :  { %v4297_v45 = vpop.eup %4296 }
0x19c4   :  { %2465 = vrot.lane.b32.xlu0 %v4297_v45, %s4365_s22 }
0x1a36   :  { %v2466_v46 = vpop.permute.xlu0 %2465 }
0x1a37   :  { %v2468_v62 = vmul.f32 %v4295_v7, %v2466_v46 }
0x1a39   :  { %2470 = vrot.lane.b32.xlu1 %v2468_v62, %s4366_s5 }
0x1aab   :  { %v2471_v47 = vpop.permute.xlu1 %2470 }
0x1aac   :  { %2474 = vst.msk [vmem:[#allocation3] sm:$0x3] %vm2473_vm1, %v2471_v47  ;;  %3925 = vmatmul.mubr.msk.f32.vlgmr.msra.gmra.mrb[22].mxu0 %vm370_vm12, %v2471_v47 }
0x1aad   :  { %4163 = vmatpush3.bf16.msra.mxu0 %v4885_v59  ;;  %3946 = vmatprep.mubr.msk.f32.mxu0 %vm4363_vm2, %v4364_v19 }
0x1aae   :  { %4164 = vmatprep.subr.bf16.mxu0 %v4362_v6 }
0x1ab1   :  { %4166 = vmatpush3.bf16.msra.mxu0 %v4895_v3 }
0x1ab2   :  { %4173 = vmatprep.subr.bf16.mxu0 %v4362_v6 }
0x1b7f   :  { %v2547_v48 = vpop.f32.mrb[22].mxu0 }
0x1b80   :  { %v2551_v49 = vadd.f32 %v2547_v48, %v4945_v35  ;;  %v3926_v50 = vpop.f32.mrb[23].mxu0 }
0x1b82   :  { %4298 = vtanh.f32 %v2551_v49  ;;  %v3429_v52 = vmul.f32 -1.442695, %v2551_v49 }
0x1b84   :  { %4300 = vpow2.f32 %v3429_v52 }
0x1b8c   :  { %v4299_v51 = vpop.eup %4298 }
0x1b8d   :  { %2561 = vrot.lane.b32.xlu0 %v4299_v51, %s4365_s22 }
0x1b8e   :  { %v4301_v53 = vpop.eup %4300 }
0x1b8f   :  { %v2555_v54 = vadd.f32 1.0, %v4301_v53 }
0x1b91   :  { %4302 = vrcp.f32 %v2555_v54 }
0x1b9b   :  { %v4303_v56 = vpop.eup %4302 }
0x1b9c   :  { %v2559_v61 = vmul.f32 %v4303_v56, %v2462_v18 }
0x1bff   :  { %v2562_v57 = vpop.permute.xlu0 %2561 }
0x1c00   :  { %v2564_v58 = vmul.f32 %v4303_v56, %v2562_v57 }
0x1c02   :  { %2566 = vrot.lane.b32.xlu1 %v2564_v58, %s4366_s5 }
0x1c74   :  { %v2567_v0 = vpop.permute.xlu1 %2566 }
0x1c75   :  { %v2569_v4 = vadd.f32 %v2567_v0, %v2559_v61 }
0x1c77   :  { %4304 = vtanh.f32 %v2569_v4 }
0x1c81   :  { %v4305_v5 = vpop.eup %4304 }
0x1c82   :  { %2572 = vrot.lane.b32.xlu0 %v4305_v5, %s4365_s22 }
0x1cf4   :  { %v2573_v2 = vpop.permute.xlu0 %2572 }
0x1cf5   :  { %v2575_v8 = vmul.f32 %v4303_v56, %v2573_v2 }
0x1cf7   :  { %2577 = vrot.lane.b32.xlu1 %v2575_v8, %s4366_s5 }
0x1d69   :  { %v2578_v9 = vpop.permute.xlu1 %2577 }
0x1d6a   :  { %2580 = vst.msk [vmem:[#allocation3 + $0x2] sm:$0x3] %vm2473_vm1, %v2578_v9  ;;  %3936 = vmatmul.mubr.msk.f32.vlgmr.msra.gmra.mrb[22].mxu1 %vm370_vm12, %v2578_v9 }
0x1d6b   :  { %4169 = vmatpush3.bf16.msra.mxu1 %v4885_v59  ;;  %3957 = vmatprep.mubr.msk.f32.mxu1 %vm4363_vm2, %v4364_v19 }
0x1d6c   :  { %4170 = vmatprep.subr.bf16.mxu1 %v4362_v6 }
0x1d6f   :  { %4172 = vmatpush3.bf16.msra.mxu1 %v4895_v3 }
0x1d70   :  { %4179 = vmatprep.subr.bf16.mxu1 %v4362_v6 }
0x1e3d   :  { %v2653_v10 = vpop.f32.mrb[22].mxu1 }
0x1e3e   :  { %v2657_v11 = vadd.f32 %v2653_v10, %v4945_v35  ;;  %v3937_v12 = vpop.f32.mrb[23].mxu1 }
0x1e40   :  { %4306 = vtanh.f32 %v2657_v11  ;;  %v3431_v13 = vmul.f32 -1.442695, %v2657_v11 }
0x1e42   :  { %4308 = vpow2.f32 %v3431_v13 }
0x1e4a   :  { %v4307_v60 = vpop.eup %4306 }
0x1e4b   :  { %2667 = vrot.lane.b32.xlu0 %v4307_v60, %s4365_s22 }
0x1e4c   :  { %v4309_v14 = vpop.eup %4308 }
0x1e4d   :  { %v2661_v15 = vadd.f32 1.0, %v4309_v14 }
0x1e4f   :  { %4310 = vrcp.f32 %v2661_v15 }
0x1e59   :  { %v4311_v16 = vpop.eup %4310 }
0x1e5a   :  { %v2665_v21 = vmul.f32 %v4311_v16, %v2569_v4 }
0x1ebd   :  { %v2668_v17 = vpop.permute.xlu0 %2667 }
0x1ebe   :  { %v2670_v20 = vmul.f32 %v4311_v16, %v2668_v17 }
0x1ec0   :  { %2672 = vrot.lane.b32.xlu1 %v2670_v20, %s4366_s5 }
0x1f32   :  { %v2673_v22 = vpop.permute.xlu1 %2672 }
0x1f33   :  { %v2675_v23 = vadd.f32 %v2673_v22, %v2665_v21 }
0x1f35   :  { %4312 = vtanh.f32 %v2675_v23 }
0x1f3f   :  { %v4313_v24 = vpop.eup %4312 }
0x1f40   :  { %2678 = vrot.lane.b32.xlu0 %v4313_v24, %s4365_s22 }
0x1fb2   :  { %v2679_v25 = vpop.permute.xlu0 %2678 }
0x1fb3   :  { %v2681_v55 = vmul.f32 %v4311_v16, %v2679_v25 }
0x1fb5   :  { %2683 = vrot.lane.b32.xlu1 %v2681_v55, %s4366_s5 }
0x2027   :  { %v2684_v1 = vpop.permute.xlu1 %2683 }
0x2028   :  { %2686 = vst.msk [vmem:[#allocation3 + $0x4] sm:$0x3] %vm2473_vm1, %v2684_v1  ;;  %3947 = vmatmul.mubr.msk.f32.vlgmr.msra.gmra.mrb[24].mxu0 %vm370_vm12, %v2684_v1 }
0x2029   :  { %4175 = vmatpush3.bf16.msra.mxu0 %v4885_v59  ;;  %3968 = vmatprep.mubr.msk.f32.mxu0 %vm4363_vm2, %v4364_v19 }
0x202a   :  { %4176 = vmatprep.subr.bf16.mxu0 %v4362_v6 }
0x202d   :  { %4178 = vmatpush3.bf16.msra.mxu0 %v4895_v3 }
0x202e   :  { %4185 = vmatprep.subr.bf16.mxu0 %v4362_v6 }
0x20fb   :  { %v2759_v26 = vpop.f32.mrb[24].mxu0 }
0x20fc   :  { %v2763_v27 = vadd.f32 %v2759_v26, %v4945_v35  ;;  %v3948_v28 = vpop.f32.mrb[25].mxu0 }
0x20fe   :  { %4314 = vtanh.f32 %v2763_v27  ;;  %v3433_v30 = vmul.f32 -1.442695, %v2763_v27 }
0x2100   :  { %4316 = vpow2.f32 %v3433_v30 }
0x2108   :  { %v4315_v29 = vpop.eup %4314 }
0x2109   :  { %2773 = vrot.lane.b32.xlu0 %v4315_v29, %s4365_s22 }
0x210a   :  { %v4317_v31 = vpop.eup %4316 }
0x210b   :  { %v2767_v63 = vadd.f32 1.0, %v4317_v31 }
0x210d   :  { %4318 = vrcp.f32 %v2767_v63 }
0x2117   :  { %v4319_v32 = vpop.eup %4318 }
0x2118   :  { %v2771_v36 = vmul.f32 %v4319_v32, %v2675_v23 }
0x217b   :  { %v2774_v33 = vpop.permute.xlu0 %2773 }
0x217c   :  { %v2776_v34 = vmul.f32 %v4319_v32, %v2774_v33 }
0x217e   :  { %2778 = vrot.lane.b32.xlu1 %v2776_v34, %s4366_s5 }
0x21f0   :  { %v2779_v37 = vpop.permute.xlu1 %2778 }
0x21f1   :  { %v2781_v38 = vadd.f32 %v2779_v37, %v2771_v36 }
0x21f3   :  { %4320 = vtanh.f32 %v2781_v38 }
0x21fd   :  { %v4321_v39 = vpop.eup %4320 }
0x21fe   :  { %2784 = vrot.lane.b32.xlu0 %v4321_v39, %s4365_s22 }
0x2270   :  { %v2785_v40 = vpop.permute.xlu0 %2784 }
0x2271   :  { %v2787_v7 = vmul.f32 %v4319_v32, %v2785_v40 }
0x2273   :  { %2789 = vrot.lane.b32.xlu1 %v2787_v7, %s4366_s5 }
0x22e5   :  { %v2790_v41 = vpop.permute.xlu1 %2789 }
0x22e6   :  { %2792 = vst.msk [vmem:[#allocation3 + $0x6] sm:$0x3] %vm2473_vm1, %v2790_v41  ;;  %3958 = vmatmul.mubr.msk.f32.vlgmr.msra.gmra.mrb[24].mxu1 %vm370_vm12, %v2790_v41 }
0x22e7   :  { %4181 = vmatpush3.bf16.msra.mxu1 %v4885_v59  ;;  %3979 = vmatprep.mubr.msk.f32.mxu1 %vm4363_vm2, %v4364_v19 }
0x22e8   :  { %4182 = vmatprep.subr.bf16.mxu1 %v4362_v6 }
0x22eb   :  { %4184 = vmatpush3.bf16.msra.mxu1 %v4895_v3 }
0x22ed   :  { %v3217_v14 = vld [vmem:[#allocation3] sm:$0xff] }
0x23b9   :  { %v2865_v42 = vpop.f32.mrb[24].mxu1 }
0x23ba   :  { %v2869_v43 = vadd.f32 %v2865_v42, %v4945_v35  ;;  %v3959_v44 = vpop.f32.mrb[25].mxu1 }
0x23bb   :  { %v3219_v44 = vld [vmem:[%s5067_s14] sm:$0xff] }
0x23bc   :  { %4322 = vtanh.f32 %v2869_v43  ;;  %v3435_v45 = vmul.f32 -1.442695, %v2869_v43 }
0x23be   :  { %4324 = vpow2.f32 %v3435_v45 }
0x23c6   :  { %v4323_v18 = vpop.eup %4322 }
0x23c7   :  { %2879 = vrot.lane.b32.xlu0 %v4323_v18, %s4365_s22  ;;  %v3220_v18 = vld [vmem:[%s5067_s14 + $0x8] sm:$0xff] }
0x23c8   :  { %v4325_v46 = vpop.eup %4324  ;;  %v4191_v45 = vpack.c.bf16 %v3220_v18, %v3219_v44 }
0x23c9   :  { %v2873_v62 = vadd.f32 1.0, %v4325_v46  ;;  %v3221_v46 = vld [vmem:[%s5067_s14 + $0x10] sm:$0xff] }
0x23ca   :  { %4192 = vmatprep.subr.bf16.mxu1 %v4191_v45 }
0x23cb   :  { %4326 = vrcp.f32 %v2873_v62  ;;  %v3222_v62 = vld [vmem:[%s5067_s14 + $0x18] sm:$0xff] }
0x23d5   :  { %v4327_v47 = vpop.eup %4326 }
0x23d6   :  { %v2877_v50 = vmul.f32 %v4327_v47, %v2781_v38 }
0x2439   :  { %v2880_v48 = vpop.permute.xlu0 %2879 }
0x243a   :  { %v2882_v49 = vmul.f32 %v4327_v47, %v2880_v48 }
0x243c   :  { %2884 = vrot.lane.b32.xlu1 %v2882_v49, %s4366_s5 }
0x24ae   :  { %v2885_v51 = vpop.permute.xlu1 %2884 }
0x24af   :  { %v2887_v52 = vadd.f32 %v2885_v51, %v2877_v50 }
0x24b1   :  { %4328 = vtanh.f32 %v2887_v52 }
0x24bb   :  { %v4329_v53 = vpop.eup %4328 }
0x24bc   :  { %2890 = vrot.lane.b32.xlu0 %v4329_v53, %s4365_s22 }
0x252e   :  { %v2891_v54 = vpop.permute.xlu0 %2890 }
0x252f   :  { %v2893_v56 = vmul.f32 %v4327_v47, %v2891_v54  ;;  %v4195_v47 = vpack.c.bf16 %v3222_v62, %v3221_v46 }
0x2531   :  { %2895 = vrot.lane.b32.xlu1 %v2893_v56, %s4366_s5 }
0x25a3   :  { %v2896_v57 = vpop.permute.xlu1 %2895 }
0x25a4   :  { %2898 = vst.msk [vmem:[#allocation3 + $0x8] sm:$0x3] %vm2473_vm1, %v2896_v57  ;;  %3969 = vmatmul.mubr.msk.f32.vlgmr.msra.gmra.mrb[26].mxu0 %vm370_vm12, %v2896_v57 }
0x25a5   :  { %4187 = vmatpush3.bf16.msra.mxu0 %v4885_v59  ;;  %3990 = vmatprep.mubr.msk.f32.mxu0 %vm4363_vm2, %v4364_v19 }
0x25a6   :  { %4188 = vmatprep.subr.bf16.mxu0 %v4362_v6 }
0x25a9   :  { %4190 = vmatpush3.bf16.msra.mxu0 %v4895_v3 }
0x2677   :  { %v2971_v58 = vpop.f32.mrb[26].mxu0 }
0x2678   :  { %v2975_v61 = vadd.f32 %v2971_v58, %v4945_v35  ;;  %v3970_v0 = vpop.f32.mrb[27].mxu0 }
0x2679   :  { %v3311_v0 = vlaneseq }
0x267a   :  { %4330 = vtanh.f32 %v2975_v61  ;;  %v3437_v5 = vmul.f32 -1.442695, %v2975_v61 }
0x267c   :  { %4332 = vpow2.f32 %v3437_v5 }
0x2684   :  { %v4331_v4 = vpop.eup %4330 }
0x2685   :  { %2985 = vrot.lane.b32.xlu0 %v4331_v4, %s4365_s22  ;;  %v3312_v4 = vand.u32 127, %v3311_v0 }
0x2686   :  { %v4333_v2 = vpop.eup %4332 }
0x2687   :  { %v2979_v8 = vadd.f32 1.0, %v4333_v2  ;;  %vm3314_vm2 = vcmp.lt.s32.totalorder %v3312_v4, 4  ;;  %vm3313_vm3 = vcmp.lt.s32.totalorder %v3312_v4, 2 }
0x2689   :  { %4334 = vrcp.f32 %v2979_v8 }
0x2693   :  { %v4335_v59 = vpop.eup %4334 }
0x2694   :  { %v2983_v6 = vmul.f32 %v4335_v59, %v2887_v52  ;;  %v3442_v52 = vld [vmem:[%s5068_s15] ss:$0 sm:$0xff] }
0x26f7   :  { %v2986_v9 = vpop.permute.xlu0 %2985 }
0x26f8   :  { %v2988_v19 = vmul.f32 %v4335_v59, %v2986_v9 }
0x26fa   :  { %2990 = vrot.lane.b32.xlu1 %v2988_v19, %s4366_s5 }
0x276c   :  { %v2991_v3 = vpop.permute.xlu1 %2990 }
0x276d   :  { %v2993_v10 = vadd.f32 %v2991_v3, %v2983_v6 }
0x276f   :  { %4336 = vtanh.f32 %v2993_v10 }
0x2779   :  { %v4337_v11 = vpop.eup %4336 }
0x277a   :  { %2996 = vrot.lane.b32.xlu0 %v4337_v11, %s4365_s22 }
0x27ec   :  { %v2997_v12 = vpop.permute.xlu0 %2996 }
0x27ed   :  { %v2999_v60 = vmul.f32 %v4335_v59, %v2997_v12 }
0x27ef   :  { %3001 = vrot.lane.b32.xlu1 %v2999_v60, %s4366_s5 }
0x2861   :  { %v3002_v13 = vpop.permute.xlu1 %3001 }
0x2862   :  { %3004 = vst.msk [vmem:[#allocation3 + $0xa] sm:$0x3] %vm2473_vm1, %v3002_v13  ;;  %3980 = vmatmul.mubr.msk.f32.vlgmr.msra.gmra.mrb[26].mxu1 %vm370_vm12, %v3002_v13 }
0x2863   :  { %4001 = vmatprep.mubr.msk.f32.mxu1 %vm370_vm12, %v3217_v14  ;;  %4194 = vmatpush3.bf16.msra.mxu1 %v4191_v45 }
0x2864   :  { %4196 = vmatprep.subr.bf16.mxu1 %v4195_v47 }
0x2867   :  { %4198 = vmatpush3.bf16.msra.mxu1 %v4195_v47 }
0x2935   :  { %v3077_v15 = vpop.f32.mrb[26].mxu1 }
0x2936   :  { %v3081_v16 = vadd.f32 %v3077_v15, %v4945_v35  ;;  %v3981_v17 = vpop.f32.mrb[27].mxu1 }
0x2938   :  { %4338 = vtanh.f32 %v3081_v16  ;;  %v3439_v21 = vmul.f32 -1.442695, %v3081_v16 }
0x293a   :  { %4340 = vpow2.f32 %v3439_v21 }
0x2942   :  { %v4339_v20 = vpop.eup %4338 }
0x2943   :  { %3091 = vrot.lane.b32.xlu0 %v4339_v20, %s4365_s22 }
0x2944   :  { %v4341_v22 = vpop.eup %4340 }
0x2945   :  { %v3085_v23 = vadd.f32 1.0, %v4341_v22 }
0x2947   :  { %4342 = vrcp.f32 %v3085_v23 }
0x2951   :  { %v4343_v24 = vpop.eup %4342 }
0x2952   :  { %v3089_v1 = vmul.f32 %v4343_v24, %v2993_v10 }
0x29b5   :  { %v3092_v25 = vpop.permute.xlu0 %3091 }
0x29b6   :  { %v3094_v55 = vmul.f32 %v4343_v24, %v3092_v25 }
0x29b8   :  { %3096 = vrot.lane.b32.xlu1 %v3094_v55, %s4366_s5 }
0x2a2a   :  { %v3097_v26 = vpop.permute.xlu1 %3096 }
0x2a2b   :  { %v3099_v27 = vadd.f32 %v3097_v26, %v3089_v1 }
0x2a2d   :  { %4344 = vtanh.f32 %v3099_v27 }
0x2a37   :  { %v4345_v28 = vpop.eup %4344 }
0x2a38   :  { %3102 = vrot.lane.b32.xlu0 %v4345_v28, %s4365_s22 }
0x2aaa   :  { %v3103_v29 = vpop.permute.xlu0 %3102 }
0x2aab   :  { %v3105_v30 = vmul.f32 %v4343_v24, %v3103_v29 }
0x2aad   :  { %3107 = vrot.lane.b32.xlu1 %v3105_v30, %s4366_s5 }
0x2b1f   :  { %v3108_v31 = vpop.permute.xlu1 %3107 }
0x2b20   :  { %3110 = vst.msk [vmem:[#allocation3 + $0xc] sm:$0x3] %vm2473_vm1, %v3108_v31  ;;  %3991 = vmatmul.mubr.msk.f32.vlgmr.msra.gmra.mrb[28].mxu0 %vm370_vm12, %v3108_v31 }
0x2bf3   :  { %v3183_v63 = vpop.f32.mrb[28].mxu0 }
0x2bf4   :  { %v3187_v32 = vadd.f32 %v3183_v63, %v4945_v35  ;;  %v3992_v33 = vpop.f32.mrb[29].mxu0 }
0x2bf6   :  { %4346 = vtanh.f32 %v3187_v32  ;;  %v3441_v36 = vmul.f32 -1.442695, %v3187_v32 }
0x2bf8   :  { %4348 = vpow2.f32 %v3441_v36 }
0x2c00   :  { %v4347_v34 = vpop.eup %4346 }
0x2c01   :  { %3197 = vrot.lane.b32.xlu0 %v4347_v34, %s4365_s22 }
0x2c02   :  { %v4349_v37 = vpop.eup %4348 }
0x2c03   :  { %v3191_v38 = vadd.f32 1.0, %v4349_v37 }
0x2c05   :  { %4350 = vrcp.f32 %v3191_v38 }
0x2c0f   :  { %v4351_v39 = vpop.eup %4350 }
0x2c10   :  { %v3195_v41 = vmul.f32 %v4351_v39, %v3099_v27 }
0x2c73   :  { %v3198_v40 = vpop.permute.xlu0 %3197 }
0x2c74   :  { %v3200_v7 = vmul.f32 %v4351_v39, %v3198_v40 }
0x2c76   :  { %3202 = vrot.lane.b32.xlu1 %v3200_v7, %s4366_s5 }
0x2ce8   :  { %v3203_v42 = vpop.permute.xlu1 %3202 }
0x2ce9   :  { %v3205_v43 = vadd.f32 %v3203_v42, %v3195_v41 }
0x2ceb   :  { %4352 = vtanh.f32 %v3205_v43 }
0x2cf5   :  { %v4353_v35 = vpop.eup %4352 }
0x2cf6   :  { %3208 = vrot.lane.b32.xlu0 %v4353_v35, %s4365_s22 }
0x2d68   :  { %v3209_v48 = vpop.permute.xlu0 %3208 }
0x2d69   :  { %v3211_v49 = vmul.f32 %v4351_v39, %v3209_v48 }
0x2d6b   :  { %3213 = vrot.lane.b32.xlu1 %v3211_v49, %s4366_s5 }
0x2ddd   :  { %v3214_v50 = vpop.permute.xlu1 %3213 }
0x2dde   :  { %3216 = vst.msk [vmem:[#allocation3 + $0xe] sm:$0x3] %vm2473_vm1, %v3214_v50 }
0x2de5   :  { %v3218_v51 = vld [vmem:[#allocation3 + $0x8] sm:$0xff] }
0x2de6   :  { %4002 = vmatmul.mubr.msk.f32.vlgmr.msra.gmra.mrb[28].mxu1 %vm370_vm12, %v3218_v51 }
0x2eb9   :  { %v4003_v53 = vpop.f32.mrb[28].mxu1 }
0x2eba   :  { %v3308_v54 = vadd.f32 %v4003_v53, %v3442_v52  ;;  %v3302_v56 = vpop.f32.mrb[29].mxu1 }
0x2ebb   :  { %v3303_v57 = vadd.f32 %v3442_v52, %v3302_v56 }
0x2ebc   :  { %v3317_v58 = vmul.f32 1.442695, %v3308_v54  ;;  %4354 = vtanh.f32 %v3308_v54 }
0x2ebd   :  { %v3315_v61 = vmul.f32 1.442695, %v3303_v57  ;;  %4356 = vtanh.f32 %v3303_v57 }
0x2ebe   :  { %4358 = vpow2.f32 %v3317_v58 }
0x2ebf   :  { %4360 = vpow2.f32 %v3315_v61 }
0x2ec6   :  { %v4355_v5 = vpop.eup %4354 }
0x2ec7   :  { %v4357_v2 = vpop.eup %4356 }
0x2ec8   :  { %v4359_v8 = vpop.eup %4358 }
0x2ec9   :  { %v4361_v59 = vpop.eup %4360  ;;  %v3322_v9 = vsel %vm3314_vm2, %v4359_v8, %v4355_v5 }
0x2eca   :  { %v3324_v19 = vsel %vm3313_vm3, %v3308_v54, %v3322_v9  ;;  %v3321_v6 = vsel %vm3314_vm2, %v4361_v59, %v4357_v2 }
0x2ecb   :  { %3327 = vst.msk [vmem:[%s5069_s16 + $0x8] sm:$0xff] %vm3325_vm4, %v3324_v19  ;;  %v3323_v3 = vsel %vm3313_vm3, %v3303_v57, %v3321_v6 }
0x2ecc   :  { %3326 = vst.msk [vmem:[%s5069_s16] sm:$0xff] %vm3325_vm4, %v3323_v3 }

</bundles_post_ra>
